<compile_context>
chip_gen: v7x
topology: tpu7x:2x2x1
jax: 0.10.0
libtpu: 0.0.40
codegen_flags: <defaults>
</compile_context>

<pallas_src>
import functools
import numpy as np
import jax
import jax.numpy as jnp
from jax.experimental import pallas as pl
from jax.experimental.pallas import tpu as pltpu

NUM_CLASSES = 12
BN_EPS = 1e-5
VMEM_LIMIT = 32 * 1024 * 1024  # safe on v5e(16 default)/v6e/v7x, generous for our tiles


def _round_up(x, m):
    return ((x + m - 1) // m) * m


# ---------------------------- Pallas kernels ----------------------------

def _conv3x3_bn_relu_kernel(x_ref, w_ref, s_ref, b_ref, o_ref, *,
                            H, W, fuse_pool, fuse_freq_mean):
    """3x3 conv (pad=1) + folded BatchNorm + ReLU for one image / one Cout tile.

    x_ref: (1, (H+3)*(W+2), Cin) fp32   flattened zero-padded image (see wrapper)
    w_ref: (3, 3, Cin, TC)        bf16  conv weights (HWIO), Cout tile TC
    s_ref, b_ref: (1, TC)         fp32  folded BN scale / bias
    o_ref: (1, H, W, TC) or (1, H/2, W/2, TC) [fused pool] or (1, H/2, TC)
           [fused pool + frequency mean]
    The 9 taps are contiguous row-offset slices of the flat padded image; the two
    extra "wrap" columns per output row are garbage and dropped in the epilogue.
    """
    Wp = W + 2
    TC = o_ref.shape[-1]
    xf = x_ref[0].astype(jnp.bfloat16)                       # (Lf, Cin) bf16 for MXU
    acc = jnp.zeros((H * Wp, TC), jnp.float32)
    for ky in range(3):                                      # 9 MXU dots, fp32 acc
        for kx in range(3):
            off = ky * Wp + kx
            acc = acc + jnp.dot(xf[off:off + H * Wp, :], w_ref[ky, kx],
                                preferred_element_type=jnp.float32)
    # fused BN + ReLU epilogue (fp32)
    y = jnp.maximum(acc * s_ref[...] + b_ref[...], 0.0)      # (H*Wp, TC)
    y3 = y.reshape(H, Wp, TC)

    if not fuse_pool:
        o_ref[0] = y3[:, :W, :]
        return

    # fused AvgPool2d(2, 2)
    Ho, Wo = H // 2, W // 2
    y4 = y3.reshape(Ho, 2, Wp, TC)
    yh = y4[:, 0, :, :] + y4[:, 1, :, :]                     # pooled along T (rows)
    yw = yh[:, :W, :].reshape(Ho * Wo, 2, TC)                # drop wrap cols, pair F
    pooled = (yw[:, 0, :] + yw[:, 1, :]) * 0.25              # (Ho*Wo, TC)

    if fuse_freq_mean:
        pr = pooled.reshape(Ho, Wo, TC)
        o_ref[0] = jnp.sum(pr, axis=1) * (1.0 / Wo)          # mean over frequency
    else:
        o_ref[0] = pooled.reshape(Ho, Wo, TC)


def _stitch_kernel(s_ref, d_ref, w_ref, os_ref, od_ref):
    """Cross-stitch per-channel mix on an (tm, C) tile.
    DOA uses the *updated* SED (matches the torch einsum sequence)."""
    sed = s_ref[...]
    doa = d_ref[...]
    w00 = w_ref[0:1, :]
    w01 = w_ref[1:2, :]
    w10 = w_ref[2:3, :]
    w11 = w_ref[3:4, :]
    new_sed = w00 * sed + w01 * doa
    new_doa = w10 * new_sed + w11 * doa
    os_ref[...] = new_sed
    od_ref[...] = new_doa


def _head_kernel(xs_ref, xd_ref, c_ref, w_ref, b_ref, act_ref, o_ref):
    """Fused (cross-stitch channel mix) + FC head for one of the 6 tracks.

    xs_ref/xd_ref: (BTp, C) fp32 shared SED / DOA features (resident across grid)
    c_ref: (1, 2, C)  per-head per-channel mix coefficients (a, b): xin = a*sed + b*doa
    w_ref: (1, C, 128) bf16  FC weight padded lane-dense to 128
    b_ref: (1, 1, 128) fp32  FC bias padded
    act_ref: (1, 1, 1) fp32  1.0 -> apply tanh (DOA heads), 0.0 -> identity (SED)
    o_ref: (1, BTp, 128) fp32
    """
    a = c_ref[0, 0:1, :]                                      # (1, C)
    b = c_ref[0, 1:2, :]                                      # (1, C)
    xin = a * xs_ref[...] + b * xd_ref[...]                   # cross-stitch (VPU)
    y = jnp.dot(xin.astype(jnp.bfloat16), w_ref[0],
                preferred_element_type=jnp.float32) + b_ref[0]
    g = act_ref[0]                                            # (1, 1)
    o_ref[0] = g * jnp.tanh(y) + (1.0 - g) * y


# ---------------------------- wrappers ----------------------------

def conv3x3_bn_relu(x, w, scale, bias, *, fuse_pool=False, fuse_freq_mean=False,
                    cout_tile=128):
    """x: (B, H, W, Cin); w: (3, 3, Cin, Cout) HWIO; folded BN scale/bias: (Cout,)."""
    B, H, W, Cin = x.shape
    Cout = w.shape[-1]
    if fuse_pool:
        assert H % 2 == 0 and W % 2 == 0, "AvgPool2d(2,2) requires even T/F"
    tc = Cout if Cout <= cout_tile else cout_tile
    assert Cout % tc == 0

    Wp = W + 2
    # zero-pad (1 top, 2 bottom, 1 left/right) and flatten spatial dims so that each
    # 3x3 tap is a contiguous row-offset slice inside the kernel (no HBM im2col).
    xp = jnp.pad(x, ((0, 0), (1, 2), (1, 1), (0, 0)))
    xf = xp.reshape(B, (H + 3) * Wp, Cin)
    wb = w.astype(jnp.bfloat16)

    if fuse_freq_mean:
        assert fuse_pool
        out_shape = (B, H // 2, Cout)
        out_spec = pl.BlockSpec((1, H // 2, tc), lambda b, j: (b, 0, j))
    elif fuse_pool:
        out_shape = (B, H // 2, W // 2, Cout)
        out_spec = pl.BlockSpec((1, H // 2, W // 2, tc), lambda b, j: (b, 0, 0, j))
    else:
        out_shape = (B, H, W, Cout)
        out_spec = pl.BlockSpec((1, H, W, tc), lambda b, j: (b, 0, 0, j))

    kernel = functools.partial(_conv3x3_bn_relu_kernel, H=H, W=W,
                               fuse_pool=fuse_pool, fuse_freq_mean=fuse_freq_mean)
    out = pl.pallas_call(
        kernel,
        out_shape=jax.ShapeDtypeStruct(out_shape, jnp.float32),
        grid=(B, Cout // tc),
        in_specs=[
            pl.BlockSpec((1, (H + 3) * Wp, Cin), lambda b, j: (b, 0, 0)),
            pl.BlockSpec((3, 3, Cin, tc), lambda b, j: (0, 0, 0, j)),
            pl.BlockSpec((1, tc), lambda b, j: (0, j)),
            pl.BlockSpec((1, tc), lambda b, j: (0, j)),
        ],
        out_specs=out_spec,
        compiler_params=pltpu.CompilerParams(
            dimension_semantics=("parallel", "parallel"),
            vmem_limit_bytes=VMEM_LIMIT),
    )(xf, wb, scale.reshape(1, Cout), bias.reshape(1, Cout))
    return out


def cross_stitch(x_sed, x_doa, stitch_param):
    """stitch_param: (C, 2, 2) as in the torch module; works on (..., C) tensors."""
    shape = x_sed.shape
    C = shape[-1]
    w = jnp.stack([stitch_param[:, 0, 0], stitch_param[:, 0, 1],
                   stitch_param[:, 1, 0], stitch_param[:, 1, 1]], axis=0)  # (4, C)
    M = int(np.prod(shape[:-1]))
    tm = min(256, _round_up(M, 8))
    Mp = _round_up(M, tm)
    s2 = x_sed.reshape(M, C)
    d2 = x_doa.reshape(M, C)
    if Mp != M:
        s2 = jnp.pad(s2, ((0, Mp - M), (0, 0)))
        d2 = jnp.pad(d2, ((0, Mp - M), (0, 0)))
    out_sed, out_doa = pl.pallas_call(
        _stitch_kernel,
        out_shape=(jax.ShapeDtypeStruct((Mp, C), jnp.float32),
                   jax.ShapeDtypeStruct((Mp, C), jnp.float32)),
        grid=(Mp // tm,),
        in_specs=[
            pl.BlockSpec((tm, C), lambda i: (i, 0)),
            pl.BlockSpec((tm, C), lambda i: (i, 0)),
            pl.BlockSpec((4, C), lambda i: (0, 0)),
        ],
        out_specs=(pl.BlockSpec((tm, C), lambda i: (i, 0)),
                   pl.BlockSpec((tm, C), lambda i: (i, 0))),
        compiler_params=pltpu.CompilerParams(
            dimension_semantics=("parallel",),
            vmem_limit_bytes=VMEM_LIMIT),
    )(s2, d2, w)
    if Mp != M:
        out_sed = out_sed[:M]
        out_doa = out_doa[:M]
    return out_sed.reshape(shape), out_doa.reshape(shape)


def fused_heads(x_sed, x_doa, stitch_params, params):
    """Fuses the 3 (B,T,C)-level cross-stitch pairs + the 6 FC heads (+ tanh for DOA)
    into one gridded kernel with a lane-dense 128-wide padded output."""
    B, T, C = x_sed.shape
    BT = B * T
    BTp = max(8, _round_up(BT, 8))
    xs = x_sed.reshape(BT, C)
    xd = x_doa.reshape(BT, C)
    if BTp != BT:
        xs = jnp.pad(xs, ((0, BTp - BT), (0, 0)))
        xd = jnp.pad(xd, ((0, BTp - BT), (0, 0)))

    # Exact per-channel cross-stitch algebra:
    #   sed_i = w00*sed + w01*doa ;  doa_i = w10*sed_i + w11*doa
    coef = []
    for i in range(3):                                    # heads 0..2: SED tracks
        w = stitch_params[i]
        coef.append(jnp.stack([w[:, 0, 0], w[:, 0, 1]], axis=0))
    for i in range(3):                                    # heads 3..5: DOA tracks
        w = stitch_params[i]
        coef.append(jnp.stack([w[:, 1, 0] * w[:, 0, 0],
                               w[:, 1, 0] * w[:, 0, 1] + w[:, 1, 1]], axis=0))
    coef = jnp.stack(coef, axis=0)                        # (6, 2, C)

    NOUT = 128                                            # lane-dense padded width
    names = ['fc_sed_track1', 'fc_sed_track2', 'fc_sed_track3',
             'fc_doa_track1', 'fc_doa_track2', 'fc_doa_track3']
    Ws, Bs = [], []
    for n in names:
        wv, bv = params[n]['w'], params[n]['b']
        Ws.append(jnp.pad(wv, ((0, 0), (0, NOUT - wv.shape[1]))))
        Bs.append(jnp.pad(bv, ((0, NOUT - bv.shape[0]),)))
    Wk = jnp.stack(Ws, axis=0).astype(jnp.bfloat16)       # (6, C, 128)
    Bk = jnp.stack(Bs, axis=0).reshape(6, 1, NOUT)        # (6, 1, 128)
    act = jnp.array([0.0, 0.0, 0.0, 1.0, 1.0, 1.0], jnp.float32).reshape(6, 1, 1)

    out = pl.pallas_call(
        _head_kernel,
        out_shape=jax.ShapeDtypeStruct((6, BTp, NOUT), jnp.float32),
        grid=(6,),
        in_specs=[
            pl.BlockSpec((BTp, C), lambda h: (0, 0)),
            pl.BlockSpec((BTp, C), lambda h: (0, 0)),
            pl.BlockSpec((1, 2, C), lambda h: (h, 0, 0)),
            pl.BlockSpec((1, C, NOUT), lambda h: (h, 0, 0)),
            pl.BlockSpec((1, 1, NOUT), lambda h: (h, 0, 0)),
            pl.BlockSpec((1, 1, 1), lambda h: (h, 0, 0)),
        ],
        out_specs=pl.BlockSpec((1, BTp, NOUT), lambda h: (h, 0, 0)),
        compiler_params=pltpu.CompilerParams(
            dimension_semantics=("parallel",),
            vmem_limit_bytes=VMEM_LIMIT),
    )(xs, xd, coef, Wk, Bk, act)

    out = out[:, :BT, :]
    sed = jnp.stack([out[0, :, :NUM_CLASSES],
                     out[1, :, :NUM_CLASSES],
                     out[2, :, :NUM_CLASSES]], axis=1).reshape(B, T, 3, NUM_CLASSES)
    doa = jnp.stack([out[3, :, :3], out[4, :, :3], out[5, :, :3]],
                    axis=1).reshape(B, T, 3, 3)
    return sed, doa


def double_conv(x, p, *, fuse_pool=False, fuse_freq_mean=False):
    x = conv3x3_bn_relu(x, p['w1'], p['s1'], p['b1'])
    x = conv3x3_bn_relu(x, p['w2'], p['s2'], p['b2'],
                        fuse_pool=fuse_pool, fuse_freq_mean=fuse_freq_mean)
    return x


# ---------------------------- parameters ----------------------------

def make_double_conv_params(key, cin, cout):
    k1, k2 = jax.random.split(key)
    fan1 = 3 * 3 * cin
    fan2 = 3 * 3 * cout
    # BN at init (eval): gamma=1, beta=0, mean=0, var=1 -> scale=1/sqrt(1+eps), bias=0.
    bn_scale = jnp.full((cout,), 1.0 / np.sqrt(1.0 + BN_EPS), jnp.float32)
    bn_bias = jnp.zeros((cout,), jnp.float32)
    return {
        'w1': jax.random.normal(k1, (3, 3, cin, cout), jnp.float32) * np.sqrt(2.0 / fan1),
        's1': bn_scale, 'b1': bn_bias,
        'w2': jax.random.normal(k2, (3, 3, cout, cout), jnp.float32) * np.sqrt(2.0 / fan2),
        's2': bn_scale, 'b2': bn_bias,
    }


def make_params(key):
    keys = jax.random.split(key, 32)
    ki = iter(keys)
    params = {
        'initial': make_double_conv_params(next(ki), 6, 64),
        'sed1': make_double_conv_params(next(ki), 64, 128),
        'doa1': make_double_conv_params(next(ki), 64, 128),
        'sed2': make_double_conv_params(next(ki), 128, 256),
        'doa2': make_double_conv_params(next(ki), 128, 256),
        'sed3': make_double_conv_params(next(ki), 256, 256),
        'doa3': make_double_conv_params(next(ki), 256, 256),
        'stitch': [
            jax.random.uniform(next(ki), (c, 2, 2), jnp.float32, 0.1, 0.9)
            for c in (128, 256, 256, 256, 256)
        ],
    }
    for name, cout in [('fc_sed_track1', NUM_CLASSES), ('fc_sed_track2', NUM_CLASSES),
                       ('fc_sed_track3', NUM_CLASSES), ('fc_doa_track1', 3),
                       ('fc_doa_track2', 3), ('fc_doa_track3', 3)]:
        kw = next(ki)
        params[name] = {
            'w': jax.random.normal(kw, (256, cout), jnp.float32) * (1.0 / np.sqrt(256.0)),
            'b': jnp.zeros((cout,), jnp.float32),
        }
    return params


# ---------------------------- forward ----------------------------

def mff_einv2_forward(params, x_nchw):
    """x_nchw: (B, 6, T, F) spectrogram (PyTorch convention)."""
    x = jnp.transpose(x_nchw, (0, 2, 3, 1)).astype(jnp.float32)   # -> (B, T, F, 6)

    # initial_stage: DoubleConv(6, 64) + Dropout(p=0.05, eval -> identity)
    x = double_conv(x, params['initial'])

    # TODO(synk): mff_module(subnetwork, tfcm_layer) source is not provided in the
    # reference module; it is a 64->64-channel block and is treated as identity here.

    # conv block 1 (DoubleConv + Dropout + AvgPool fused into conv2) and cross-stitch 0
    x_sed = double_conv(x, params['sed1'], fuse_pool=True)
    x_doa = double_conv(x, params['doa1'], fuse_pool=True)
    x_sed, x_doa = cross_stitch(x_sed, x_doa, params['stitch'][0])

    # conv block 2 and cross-stitch 1
    x_sed = double_conv(x_sed, params['sed2'], fuse_pool=True)
    x_doa = double_conv(x_doa, params['doa2'], fuse_pool=True)
    x_sed, x_doa = cross_stitch(x_sed, x_doa, params['stitch'][1])

    # conv block 3: AvgPool AND mean-over-frequency fused into conv2 -> (B, T', 256)
    # (torch's permute(0,2,1) is implicit in NHWC layout)
    x_sed = double_conv(x_sed, params['sed3'], fuse_pool=True, fuse_freq_mean=True)
    x_doa = double_conv(x_doa, params['doa3'], fuse_pool=True, fuse_freq_mean=True)

    # TODO(synk): ConformerBlocks(encoder_dim=256, num_layers=2) is an external module
    # whose definition is not provided; the six conformer tracks are identity here.

    # cross-stitch 2..4 + the six FC heads (+ tanh for DOA) in one fused kernel
    sed, doa = fused_heads(x_sed, x_doa, params['stitch'][2:5], params)

    return {'sed': sed, 'doa': doa}


if __name__ == "__main__":
    key = jax.random.PRNGKey(0)
    kp, kx = jax.random.split(key)
    params = make_params(kp)
    x = jax.random.normal(kx, (2, 6, 16, 16), jnp.float32)   # (B, C=6, T=16, F=16)
    out = mff_einv2_forward(params, x)
    jax.block_until_ready(out['sed'])
    jax.block_until_ready(out['doa'])
    assert out['sed'].shape == (2, 2, 3, NUM_CLASSES), out['sed'].shape
    assert out['doa'].shape == (2, 2, 3, 3), out['doa'].shape
    assert bool(jnp.all(jnp.isfinite(out['sed']))) and bool(jnp.all(jnp.isfinite(out['doa'])))
    print("KERNEL_OK")
</pallas_src>

<mosaic_0001>
module attributes {stable_mosaic.version = 11 : i64} {
  func.func @_conv3x3_bn_relu_kernel(%arg0: i32, %arg1: i32, %arg2: memref<1x342x6xf32, #tpu.memory_space<vmem>>, %arg3: memref<3x3x6x64xbf16, #tpu.memory_space<vmem>>, %arg4: memref<1x64xf32, #tpu.memory_space<vmem>>, %arg5: memref<1x64xf32, #tpu.memory_space<vmem>>, %arg6: memref<1x16x16x64xf32, #tpu.memory_space<vmem>>) attributes {dimension_semantics = [#tpu.dimension_semantics<parallel>, #tpu.dimension_semantics<parallel>], iteration_bounds = array<i64: 2, 1>, scalar_prefetch = 0 : i64, scratch_operands = 0 : i64, tpu.core_type = #tpu.core_type<tc>, window_params = [{transform_indices = @transform_0, window_bounds = array<i64: 1, 342, 6>}, {transform_indices = @transform_1, window_bounds = array<i64: 3, 3, 6, 64>}, {transform_indices = @transform_2, window_bounds = array<i64: 1, 64>}, {transform_indices = @transform_3, window_bounds = array<i64: 1, 64>}, {transform_indices = @transform_4, window_bounds = array<i64: 1, 16, 16, 64>}]} {
    %c0 = arith.constant 0 : index
    %c0_0 = arith.constant 0 : index
    %c0_1 = arith.constant 0 : index
    %0 = vector.load %arg2[%c0, %c0_0, %c0_1] : memref<1x342x6xf32, #tpu.memory_space<vmem>>, vector<1x342x6xf32>
    %1 = vector.shape_cast %0 : vector<1x342x6xf32> to vector<342x6xf32>
    %2 = arith.truncf %1 : vector<342x6xf32> to vector<342x6xbf16>
    %cst = arith.constant 0.000000e+00 : f32
    %3 = vector.broadcast %cst : f32 to vector<288x64xf32>
    %4 = vector.extract_strided_slice %2 {offsets = [0, 0], sizes = [288, 6], strides = [1, 1]} : vector<342x6xbf16> to vector<288x6xbf16>
    %c0_2 = arith.constant 0 : index
    %c0_3 = arith.constant 0 : index
    %c0_4 = arith.constant 0 : index
    %c0_5 = arith.constant 0 : index
    %5 = vector.load %arg3[%c0_2, %c0_3, %c0_4, %c0_5] : memref<3x3x6x64xbf16, #tpu.memory_space<vmem>>, vector<1x1x6x64xbf16>
    %6 = vector.shape_cast %5 : vector<1x1x6x64xbf16> to vector<6x64xbf16>
    %cst_6 = arith.constant dense<0.000000e+00> : vector<288x64xf32>
    %7 = tpu.matmul %4, %6, %cst_6 {dimension_numbers = #tpu.dot_dimension_numbers<[1], [0], [0], [1], [0, 0, 1, 1], [], []>} : vector<288x6xbf16>, vector<6x64xbf16>, vector<288x64xf32> -> vector<288x64xf32>
    %8 = arith.addf %3, %7 : vector<288x64xf32>
    %9 = vector.extract_strided_slice %2 {offsets = [1, 0], sizes = [288, 6], strides = [1, 1]} : vector<342x6xbf16> to vector<288x6xbf16>
    %c0_7 = arith.constant 0 : index
    %c1 = arith.constant 1 : index
    %c0_8 = arith.constant 0 : index
    %c0_9 = arith.constant 0 : index
    %10 = vector.load %arg3[%c0_7, %c1, %c0_8, %c0_9] : memref<3x3x6x64xbf16, #tpu.memory_space<vmem>>, vector<1x1x6x64xbf16>
    %11 = vector.shape_cast %10 : vector<1x1x6x64xbf16> to vector<6x64xbf16>
    %cst_10 = arith.constant dense<0.000000e+00> : vector<288x64xf32>
    %12 = tpu.matmul %9, %11, %cst_10 {dimension_numbers = #tpu.dot_dimension_numbers<[1], [0], [0], [1], [0, 0, 1, 1], [], []>} : vector<288x6xbf16>, vector<6x64xbf16>, vector<288x64xf32> -> vector<288x64xf32>
    %13 = arith.addf %8, %12 : vector<288x64xf32>
    %14 = vector.extract_strided_slice %2 {offsets = [2, 0], sizes = [288, 6], strides = [1, 1]} : vector<342x6xbf16> to vector<288x6xbf16>
    %c0_11 = arith.constant 0 : index
    %c2 = arith.constant 2 : index
    %c0_12 = arith.constant 0 : index
    %c0_13 = arith.constant 0 : index
    %15 = vector.load %arg3[%c0_11, %c2, %c0_12, %c0_13] : memref<3x3x6x64xbf16, #tpu.memory_space<vmem>>, vector<1x1x6x64xbf16>
    %16 = vector.shape_cast %15 : vector<1x1x6x64xbf16> to vector<6x64xbf16>
    %cst_14 = arith.constant dense<0.000000e+00> : vector<288x64xf32>
    %17 = tpu.matmul %14, %16, %cst_14 {dimension_numbers = #tpu.dot_dimension_numbers<[1], [0], [0], [1], [0, 0, 1, 1], [], []>} : vector<288x6xbf16>, vector<6x64xbf16>, vector<288x64xf32> -> vector<288x64xf32>
    %18 = arith.addf %13, %17 : vector<288x64xf32>
    %19 = vector.extract_strided_slice %2 {offsets = [18, 0], sizes = [288, 6], strides = [1, 1]} : vector<342x6xbf16> to vector<288x6xbf16>
    %c1_15 = arith.constant 1 : index
    %c0_16 = arith.constant 0 : index
    %c0_17 = arith.constant 0 : index
    %c0_18 = arith.constant 0 : index
    %20 = vector.load %arg3[%c1_15, %c0_16, %c0_17, %c0_18] : memref<3x3x6x64xbf16, #tpu.memory_space<vmem>>, vector<1x1x6x64xbf16>
    %21 = vector.shape_cast %20 : vector<1x1x6x64xbf16> to vector<6x64xbf16>
    %cst_19 = arith.constant dense<0.000000e+00> : vector<288x64xf32>
    %22 = tpu.matmul %19, %21, %cst_19 {dimension_numbers = #tpu.dot_dimension_numbers<[1], [0], [0], [1], [0, 0, 1, 1], [], []>} : vector<288x6xbf16>, vector<6x64xbf16>, vector<288x64xf32> -> vector<288x64xf32>
    %23 = arith.addf %18, %22 : vector<288x64xf32>
    %24 = vector.extract_strided_slice %2 {offsets = [19, 0], sizes = [288, 6], strides = [1, 1]} : vector<342x6xbf16> to vector<288x6xbf16>
    %c1_20 = arith.constant 1 : index
    %c1_21 = arith.constant 1 : index
    %c0_22 = arith.constant 0 : index
    %c0_23 = arith.constant 0 : index
    %25 = vector.load %arg3[%c1_20, %c1_21, %c0_22, %c0_23] : memref<3x3x6x64xbf16, #tpu.memory_space<vmem>>, vector<1x1x6x64xbf16>
    %26 = vector.shape_cast %25 : vector<1x1x6x64xbf16> to vector<6x64xbf16>
    %cst_24 = arith.constant dense<0.000000e+00> : vector<288x64xf32>
    %27 = tpu.matmul %24, %26, %cst_24 {dimension_numbers = #tpu.dot_dimension_numbers<[1], [0], [0], [1], [0, 0, 1, 1], [], []>} : vector<288x6xbf16>, vector<6x64xbf16>, vector<288x64xf32> -> vector<288x64xf32>
    %28 = arith.addf %23, %27 : vector<288x64xf32>
    %29 = vector.extract_strided_slice %2 {offsets = [20, 0], sizes = [288, 6], strides = [1, 1]} : vector<342x6xbf16> to vector<288x6xbf16>
    %c1_25 = arith.constant 1 : index
    %c2_26 = arith.constant 2 : index
    %c0_27 = arith.constant 0 : index
    %c0_28 = arith.constant 0 : index
    %30 = vector.load %arg3[%c1_25, %c2_26, %c0_27, %c0_28] : memref<3x3x6x64xbf16, #tpu.memory_space<vmem>>, vector<1x1x6x64xbf16>
    %31 = vector.shape_cast %30 : vector<1x1x6x64xbf16> to vector<6x64xbf16>
    %cst_29 = arith.constant dense<0.000000e+00> : vector<288x64xf32>
    %32 = tpu.matmul %29, %31, %cst_29 {dimension_numbers = #tpu.dot_dimension_numbers<[1], [0], [0], [1], [0, 0, 1, 1], [], []>} : vector<288x6xbf16>, vector<6x64xbf16>, vector<288x64xf32> -> vector<288x64xf32>
    %33 = arith.addf %28, %32 : vector<288x64xf32>
    %34 = vector.extract_strided_slice %2 {offsets = [36, 0], sizes = [288, 6], strides = [1, 1]} : vector<342x6xbf16> to vector<288x6xbf16>
    %c2_30 = arith.constant 2 : index
    %c0_31 = arith.constant 0 : index
    %c0_32 = arith.constant 0 : index
    %c0_33 = arith.constant 0 : index
    %35 = vector.load %arg3[%c2_30, %c0_31, %c0_32, %c0_33] : memref<3x3x6x64xbf16, #tpu.memory_space<vmem>>, vector<1x1x6x64xbf16>
    %36 = vector.shape_cast %35 : vector<1x1x6x64xbf16> to vector<6x64xbf16>
    %cst_34 = arith.constant dense<0.000000e+00> : vector<288x64xf32>
    %37 = tpu.matmul %34, %36, %cst_34 {dimension_numbers = #tpu.dot_dimension_numbers<[1], [0], [0], [1], [0, 0, 1, 1], [], []>} : vector<288x6xbf16>, vector<6x64xbf16>, vector<288x64xf32> -> vector<288x64xf32>
    %38 = arith.addf %33, %37 : vector<288x64xf32>
    %39 = vector.extract_strided_slice %2 {offsets = [37, 0], sizes = [288, 6], strides = [1, 1]} : vector<342x6xbf16> to vector<288x6xbf16>
    %c2_35 = arith.constant 2 : index
    %c1_36 = arith.constant 1 : index
    %c0_37 = arith.constant 0 : index
    %c0_38 = arith.constant 0 : index
    %40 = vector.load %arg3[%c2_35, %c1_36, %c0_37, %c0_38] : memref<3x3x6x64xbf16, #tpu.memory_space<vmem>>, vector<1x1x6x64xbf16>
    %41 = vector.shape_cast %40 : vector<1x1x6x64xbf16> to vector<6x64xbf16>
    %cst_39 = arith.constant dense<0.000000e+00> : vector<288x64xf32>
    %42 = tpu.matmul %39, %41, %cst_39 {dimension_numbers = #tpu.dot_dimension_numbers<[1], [0], [0], [1], [0, 0, 1, 1], [], []>} : vector<288x6xbf16>, vector<6x64xbf16>, vector<288x64xf32> -> vector<288x64xf32>
    %43 = arith.addf %38, %42 : vector<288x64xf32>
    %44 = vector.extract_strided_slice %2 {offsets = [38, 0], sizes = [288, 6], strides = [1, 1]} : vector<342x6xbf16> to vector<288x6xbf16>
    %c2_40 = arith.constant 2 : index
    %c2_41 = arith.constant 2 : index
    %c0_42 = arith.constant 0 : index
    %c0_43 = arith.constant 0 : index
    %45 = vector.load %arg3[%c2_40, %c2_41, %c0_42, %c0_43] : memref<3x3x6x64xbf16, #tpu.memory_space<vmem>>, vector<1x1x6x64xbf16>
    %46 = vector.shape_cast %45 : vector<1x1x6x64xbf16> to vector<6x64xbf16>
    %cst_44 = arith.constant dense<0.000000e+00> : vector<288x64xf32>
    %47 = tpu.matmul %44, %46, %cst_44 {dimension_numbers = #tpu.dot_dimension_numbers<[1], [0], [0], [1], [0, 0, 1, 1], [], []>} : vector<288x6xbf16>, vector<6x64xbf16>, vector<288x64xf32> -> vector<288x64xf32>
    %48 = arith.addf %43, %47 : vector<288x64xf32>
    %c0_45 = arith.constant 0 : index
    %c0_46 = arith.constant 0 : index
    %49 = vector.load %arg4[%c0_45, %c0_46] : memref<1x64xf32, #tpu.memory_space<vmem>>, vector<1x64xf32>
    %50 = vector.broadcast %49 : vector<1x64xf32> to vector<288x64xf32>
    %51 = arith.mulf %48, %50 : vector<288x64xf32>
    %c0_47 = arith.constant 0 : index
    %c0_48 = arith.constant 0 : index
    %52 = vector.load %arg5[%c0_47, %c0_48] : memref<1x64xf32, #tpu.memory_space<vmem>>, vector<1x64xf32>
    %53 = vector.broadcast %52 : vector<1x64xf32> to vector<288x64xf32>
    %54 = arith.addf %51, %53 : vector<288x64xf32>
    %cst_49 = arith.constant 0.000000e+00 : f32
    %55 = vector.broadcast %cst_49 : f32 to vector<288x64xf32>
    %56 = arith.maximumf %54, %55 : vector<288x64xf32>
    %57 = vector.shape_cast %56 : vector<288x64xf32> to vector<16x18x64xf32>
    %58 = vector.extract_strided_slice %57 {offsets = [0, 0, 0], sizes = [16, 16, 64], strides = [1, 1, 1]} : vector<16x18x64xf32> to vector<16x16x64xf32>
    %c0_50 = arith.constant 0 : index
    %c0_51 = arith.constant 0 : index
    %c0_52 = arith.constant 0 : index
    %c0_53 = arith.constant 0 : index
    %59 = vector.load %arg6[%c0_50, %c0_51, %c0_52, %c0_53] : memref<1x16x16x64xf32, #tpu.memory_space<vmem>>, vector<1x16x16x64xf32>
    %60 = vector.shape_cast %59 : vector<1x16x16x64xf32> to vector<16x16x64xf32>
    %61 = vector.shape_cast %58 : vector<16x16x64xf32> to vector<1x16x16x64xf32>
    tpu.vector_store %arg6[%c0_50, %c0_51, %c0_52, %c0_53], %61 {strides = array<i32>} : memref<1x16x16x64xf32, #tpu.memory_space<vmem>>, vector<1x16x16x64xf32>,
    return
  }
  func.func @transform_0(%arg0: i32, %arg1: i32) -> (i32, i32, i32) {
    %c0_i32 = arith.constant 0 : i32
    %c0_i32_0 = arith.constant 0 : i32
    %c0_i32_1 = arith.constant 0 : i32
    return %arg0, %c0_i32, %c0_i32_0 : i32, i32, i32
  }
  func.func @transform_1(%arg0: i32, %arg1: i32) -> (i32, i32, i32, i32) {
    %c0_i32 = arith.constant 0 : i32
    %c0_i32_0 = arith.constant 0 : i32
    %c0_i32_1 = arith.constant 0 : i32
    %c0_i32_2 = arith.constant 0 : i32
    return %c0_i32, %c0_i32_0, %c0_i32_1, %arg1 : i32, i32, i32, i32
  }
  func.func @transform_2(%arg0: i32, %arg1: i32) -> (i32, i32) {
    %c0_i32 = arith.constant 0 : i32
    %c0_i32_0 = arith.constant 0 : i32
    return %c0_i32, %arg1 : i32, i32
  }
  func.func @transform_3(%arg0: i32, %arg1: i32) -> (i32, i32) {
    %c0_i32 = arith.constant 0 : i32
    %c0_i32_0 = arith.constant 0 : i32
    return %c0_i32, %arg1 : i32, i32
  }
  func.func @transform_4(%arg0: i32, %arg1: i32) -> (i32, i32, i32, i32) {
    %c0_i32 = arith.constant 0 : i32
    %c0_i32_0 = arith.constant 0 : i32
    %c0_i32_1 = arith.constant 0 : i32
    return %arg0, %c0_i32, %c0_i32_0, %arg1 : i32, i32, i32, i32
  }
}

</mosaic_0001>

<bundles_post_ra>
// kernel: tpu_custom_call.1
= control target key start
LH: loop header
LB: loop body
LE: loop exit
PB: predicated region body
PF: predicated region fallthrough
CT: control target
= control target key end

     0   :  { %9 = vsyncpa [#allocation3], 0  ;;  %s7229_s0 = inlined_call_operand.vmem [shape: f32[2,342,6], index: 0, kind: input, shape index: {}]   ;;  %s7230_s1 = inlined_call_operand.vmem [shape: bf16[3,3,6,64], index: 1, kind: input, shape index: {}]   ;;  %s7231_s2 = inlined_call_operand.vmem [shape: f32[1,64], index: 2, kind: input, shape index: {}]   ;;  %s7232_s3 = inlined_call_operand.vmem [shape: f32[1,64], index: 3, kind: input, shape index: {}]   ;;  %s7233_s4 = inlined_call_operand.hbm [shape: f32[2,16,16,64], index: 4, kind: output, shape index: {}]  }
   0x1   :  { %11 = vsyncpa [#allocation3 + $0x1], 0  ;;  %s5696_s15 = smov 0   ;;  %s5698_s16 = smov 0  }
   0x2   :  { %s5700_s17 = smov 0   ;;  %s5702_s18 = smov 0  }
   0x3   :  { %s5704_s19 = smov 0   ;;  %s5706_s20 = smov 0  }
   0x4 LB: > { %s4525_s21 = sadd.s32 4294967295, %s5665_s20   ;;  %s4526_s22 = sadd.s32 4294967294, %s5665_s20   ;;  %s5665_s20 = sphi %s5706_s20, %s17_s20   ;;  %s5661_s19 = sphi %s5704_s19, %s7305_s19   ;;  %s5657_s18 = sphi %s5702_s18, %s7304_s18   ;;  %s5653_s17 = sphi %s5700_s17, %s7303_s17   ;;  %s5649_s16 = sphi %s5698_s16, %s7302_s16   ;;  %s5645_s15 = sphi %s5696_s15, %s7301_s15  }
   0x5   : > { %s29_s23 = sadd.s32 1, %s5661_s19  ;;  %s142_s24 = sadd.s32 1, %s5653_s17 }
   0x6   : > { %p31_p0 = scmp.ge.s32.totalorder %s29_s23, 2  ;;  %p152_p1 = scmp.ne.s32.totalorder %s5653_s17, %s5649_s16 }
   0x7   : > { %p153_p2 = scmp.eq.s32.totalorder %s4525_s21, 1  ;;  %p158_p3 = scmp.ne.s32.totalorder %s5649_s16, %s5645_s15 }
   0x8   : > { %s7307_s23 = smov (%p31_p0, %s29_s23), 0  ;;  %p159_p5 = scmp.eq.s32.totalorder %s4526_s22, 1 }
   0x9   : > { %p5736_p4 = por %p153_p2, %p152_p1  ;;  %s137_s26 = ssub.s32 %s5661_s19, %s7307_s23 }
   0xa   : > { %p4532_p6 = scmp.ge.s32.totalorder %s5665_s20, 1  ;;  %p140_p7 = scmp.eq.s32.totalorder %s137_s26, 0 }
   0xb   : > { %p5743_p8 = por %p159_p5, %p158_p3  ;;  %p204_p9 = scmp.lt.s32.totalorder %s5665_s20, 3 }
   0xc   : > { %s5749_s28 = scalar_select %p140_p7, %s5653_s17, %s142_s24  }
   0xd   : > { %p205_p10 = pnand %p4532_p6, %p204_p9 }
   0xf   : > { %208 = sbr.rel (%p205_p10) target bundleno = 656 (0x290), region = 36 }
  0x16   : > { %vm526_vm0 = vcmask 1042432   ;;  %v5754_v0 = vld [vmem:[%s7230_s1 + $0x10] sm:$0x7]  ;;  %v4535_v1 = vld [vmem:[%s7230_s1 + $0x4] sm:$0x7]  ;;  %p240_p11 = scmp.lt.s32.totalorder %s5657_s18, 1 }
  0x17   : > { %7266 = vst [vmem:[#allocation5_spill] sm:$0xff] %v5754_v0  ;;  %5520 = vmatprep.subr.msk.bf16.mxu0 %vm526_vm0, %v5754_v0  ;;  %5516 = vmatprep.subr.msk.bf16.mxu1 %vm526_vm0, %v4535_v1  ;;  %v5765_v2 = vsel %vm526_vm0, %v5754_v0, 0  ;;  %v528_v3 = vsel %vm526_vm0, %v4535_v1, 0  ;;  %v4629_v4 = vld [vmem:[%s7230_s1 + $0x14] sm:$0x7]  ;;  %vm471_vm2 = vcmask 48128  }
  0x18   : > { %7267 = vst [vmem:[#allocation6_spill] sm:$0xff] %v5765_v2  ;;  %5037 = vmatpush3.bf16.msra.mxu0 %v5765_v2  ;;  %4885 = vmatpush3.bf16.msra.mxu1 %v528_v3  ;;  %s241_s7 = scalar_select %p240_p11, %s5657_s18, 1  ;;  %v319_v5 = vld [vmem:[%s7230_s1] sm:$0x7]  ;;  %vm322_vm1 = vsmask.f32 7424 }
  0x19   : > { %5522 = vmatprep.subr.msk.bf16.mxu0 %vm526_vm0, %v4629_v4  ;;  %5517 = vmatprep.subr.msk.bf16.mxu1 %vm526_vm0, %v319_v5  ;;  %vm1478_vm3 = vsmask.f32 6400  ;;  %v1926_v17 = vsel %vm526_vm0, %v4629_v4, 0  ;;  %v744_v23 = vsel %vm526_vm0, %v319_v5, 0  ;;  %v5852_v62 = vld [vmem:[%s7230_s1 + $0x8] sm:$0x7] }
  0x1a   : > { %s5526_s12 = smul.u32 344, %s241_s7  ;;  %vm1833_vm4 = vcmask 1045504   ;;  %vm2367_vm5 = vsmask.f32 5376  ;;  %vm944_vm6 = vcmask 1046528   ;;  %vm2720_vm7 = vcmask 1044480  }
  0x1b   : > { %vm4366_vm8 = vcmask 523264   ;;  %s237_s14 = sand.u32 1, %s5649_s16   ;;  %s4712_s5 = sshll.u32 %s5657_s18, 12 }
  0x1c   : > { %s5781_s21 = scalar_lea.vmem %s7229_s0, %s5526_s12  ;;  %s7173_s9 = scalar_lea.hbm %s7233_s4, %s4712_s5 }
  0x1d   : > { %v256_v6 = vld [vmem:[%s5781_s21] sm:$0xff]  ;;  %v257_v7 = vld [vmem:[%s5781_s21 + $0x8] sm:$0xff]  ;;  %v258_v8 = vld [vmem:[%s5781_s21 + $0x10] sm:$0xff]  ;;  %s7183_s18 = scalar_lea.sflag [#allocation3], %s237_s14  ;;  %s5668_s11 = smov [#allocation2]  }
  0x1e   : > { %v259_v9 = vld [vmem:[%s5781_s21 + $0x18] sm:$0xff]  ;;  %v5787_v10 = vpack.c.bf16 %v257_v7, %v256_v6  ;;  %v260_v11 = vld [vmem:[%s5781_s21 + $0x20] sm:$0xff]  ;;  %v261_v12 = vld [vmem:[%s5781_s21 + $0x28] sm:$0xff]  ;;  %s5591_s12 = sshll.u32 %s5668_s11, 4  ;;  %s5592_s12 = int_to_ptr.vmem [resolvable:$false] %s5591_s12 }
  0x1f   : > { %v5791_v13 = vpack.c.bf16 %v259_v9, %v258_v8  ;;  %v5793_v14 = vpack.c.bf16 %v261_v12, %v260_v11  ;;  %v262_v15 = vld [vmem:[%s5781_s21 + $0x30] sm:$0xff]  ;;  %v263_v16 = vld [vmem:[%s5781_s21 + $0x38] sm:$0xff]  ;;  %v264_v18 = vld [vmem:[%s5781_s21 + $0x40] sm:$0xff]  ;;  %s5593_s13 = scalar_lea.vmem %s5592_s12, 8192 }
  0x20   : > { %v324_v19 = vshrl.u32 %v5787_v10, 16  ;;  %v326_v20 = vshll.u32 %v5787_v10, 16  ;;  %v5801_v21 = vpack.c.bf16 %v263_v16, %v262_v15  ;;  %v265_v22 = vld [vmem:[%s5781_s21 + $0x48] sm:$0xff]  ;;  %v266_v44 = vld [vmem:[%s5781_s21 + $0x50] sm:$0xff]  ;;  %v267_v49 = vld [vmem:[%s5781_s21 + $0x58] sm:$0xff] }
  0x21   : > { %v331_v24 = vshll.u32 %v5791_v13, 16  ;;  %v335_v25 = vshrl.u32 %v5791_v13, 16  ;;  %v5808_v26 = vshll.u32 %v5793_v14, 16  ;;  %v5811_v27 = vshrl.u32 %v5793_v14, 16  ;;  %v268_v50 = vld [vmem:[%s5781_s21 + $0x60] sm:$0xff]  ;;  %v269_v51 = vld [vmem:[%s5781_s21 + $0x68] sm:$0xff] }
  0x22   : > { %v328_v28 = vrot.slane %v326_v20, 1  ;;  %v5814_v29 = vshll.u32 %v5801_v21, 16  ;;  %v5817_v30 = vshrl.u32 %v5801_v21, 16  ;;  %v5819_v31 = vpack.c.bf16 %v265_v22, %v264_v18  ;;  %v270_v56 = vld [vmem:[%s5781_s21 + $0x70] sm:$0xff]  ;;  %v271_v57 = vld [vmem:[%s5781_s21 + $0x78] sm:$0xff]  ;;  %v272_v5 = vld [vmem:[%s5781_s21 + $0x80] sm:$0xff] }
  0x23   : > { %v333_v32 = vrot.slane %v331_v24, 1  ;;  %v1479_v33 = vrot.slane %v335_v25, 1  ;;  %v1480_v34 = vrot.slane %v331_v24, 2  ;;  %v1482_v35 = vrot.slane %v5811_v27, 1  ;;  %v273_v6 = vld [vmem:[%s5781_s21 + $0x88] sm:$0xff] }
  0x24   : > { %v329_v36 = vor.u32 %v328_v28, %v324_v19  ;;  %v1483_v37 = vrot.slane %v5808_v26, 2  ;;  %v341_v38 = vrot.slane %v5808_v26, 1  ;;  %v1486_v39 = vrot.slane %v5817_v30, 1  ;;  %v5867_v7 = vld [vmem:[%s7230_s1 + $0x18] sm:$0x7] }
  0x25   : > { %v337_v40 = vor.u32 %v335_v25, %v333_v32  ;;  %v1481_v41 = vor.u32 %v1480_v34, %v1479_v33  ;;  %v1487_v42 = vrot.slane %v5814_v29, 2  ;;  %v349_v43 = vrot.slane %v5814_v29, 1 }
  0x26   : > { %v334_v45 = vsel %vm322_vm1, %v329_v36, %v333_v32  ;;  %v1484_v46 = vor.u32 %v1483_v37, %v1482_v35  ;;  %v345_v47 = vor.u32 %v5811_v27, %v341_v38  ;;  %v5831_v48 = vshll.u32 %v5819_v31, 16 }
  0x27   : > { %4886 = vmatprep.mubr.msk.bf16.mxu1 %vm471_vm2, %v334_v45  ;;  %v342_v52 = vsel %vm322_vm1, %v337_v40, %v341_v38  ;;  %v1488_v53 = vor.u32 %v1487_v42, %v1486_v39  ;;  %v5839_v54 = vshrl.u32 %v5819_v31, 16  ;;  %v353_v55 = vor.u32 %v5817_v30, %v349_v43  ;;  %v275_v42 = vld [vmem:[%s5781_s21 + $0x98] sm:$0xff] }
  0x28   : > { %v1485_v58 = vsel %vm1478_vm3, %v1481_v41, %v1484_v46  ;;  %4887 = vmatmul.mubr.msk.bf16.vlgmr.msra.gmra.mrb[0].mxu1 %vm471_vm2, %v342_v52  ;;  %v350_v59 = vsel %vm322_vm1, %v345_v47, %v349_v43  ;;  %v1491_v60 = vrot.slane %v5831_v48, 2  ;;  %v357_v61 = vrot.slane %v5831_v48, 1  ;;  %v274_v41 = vld [vmem:[%s5781_s21 + $0x90] sm:$0xff]  ;;  %v277_v47 = vld [vmem:[%s5781_s21 + $0xa8] sm:$0xff] }
  0x29   : > { %5038 = vmatprep.mubr.msk.bf16.mxu0 %vm471_vm2, %v1485_v58  ;;  %v1489_v63 = vsel %vm1478_vm3, %v1484_v46, %v1488_v53  ;;  %4890 = vmatprep.mubr.msk.bf16.mxu1 %vm471_vm2, %v350_v59  ;;  %v1490_v1 = vrot.slane %v5839_v54, 1  ;;  %v5858_v3 = vpack.c.bf16 %v267_v49, %v266_v44  ;;  %v5860_v4 = vpack.c.bf16 %v269_v51, %v268_v50  ;;  %v276_v46 = vld [vmem:[%s5781_s21 + $0xa0] sm:$0xff]  ;;  %v278_v58 = vld [vmem:[%s5781_s21 + $0xb0] sm:$0xff]  ;;  %v279_v59 = vld [vmem:[%s5781_s21 + $0xb8] sm:$0xff] }
  0x2a   : > { %5039 = vmatmul.mubr.msk.bf16.vlgmr.msra.gmra.mrb[0].mxu0 %vm471_vm2, %v1489_v63  ;;  %v358_v8 = vsel %vm322_vm1, %v353_v55, %v357_v61  ;;  %4923 = vmatpush3.bf16.msra.mxu1 %v744_v23  ;;  %v361_v9 = vor.u32 %v5839_v54, %v357_v61  ;;  %v5872_v11 = vpack.c.bf16 %v271_v57, %v270_v56 }
  0x2b   : > { %5075 = vmatpush3.bf16.msra.mxu0 %v1926_v17  ;;  %v1492_v12 = vor.u32 %v1491_v60, %v1490_v1  ;;  %v5875_v15 = vshll.u32 %v5858_v3, 16  ;;  %v5878_v16 = vshrl.u32 %v5858_v3, 16  ;;  %v5881_v18 = vshll.u32 %v5860_v4, 16  ;;  %5518 = vmatprep.subr.msk.bf16.mxu1 %vm526_vm0, %v5852_v62 }
  0x2c   : > { %v5886_v19 = vshrl.u32 %v5860_v4, 16  ;;  %v5889_v20 = vshll.u32 %v5872_v11, 16  ;;  %v5892_v17 = vshrl.u32 %v5872_v11, 16  ;;  %v5894_v22 = vpack.c.bf16 %v273_v6, %v272_v5  ;;  %5523 = vmatprep.subr.msk.bf16.mxu0 %vm526_vm0, %v5867_v7 }
  0x2d   : > { %v1493_v23 = vsel %vm1478_vm3, %v1488_v53, %v1492_v12  ;;  %v1494_v24 = vrot.slane %v5878_v16, 1  ;;  %v1495_v25 = vrot.slane %v5875_v15, 2  ;;  %v365_v28 = vrot.slane %v5875_v15, 1 }
  0x2e   : > { %5042 = vmatprep.mubr.msk.bf16.mxu0 %vm471_vm2, %v1493_v23  ;;  %v1498_v32 = vrot.slane %v5886_v19, 1  ;;  %v1499_v33 = vrot.slane %v5881_v18, 2  ;;  %v1502_v36 = vrot.slane %v5892_v17, 1  ;;  %v1503_v37 = vrot.slane %v5889_v20, 2 }
  0x2f   : > { %v1496_v34 = vor.u32 %v1495_v25, %v1494_v24  ;;  %v366_v35 = vsel %vm322_vm1, %v361_v9, %v365_v28  ;;  %v373_v39 = vrot.slane %v5881_v18, 1  ;;  %v5911_v40 = vshll.u32 %v5894_v22, 16 }
  0x30   : > { %4891 = vmatmul.mubr.msk.bf16.gmra.mrb[4].mxu1 %vm471_vm2, %v358_v8  ;;  %v1500_v38 = vor.u32 %v1499_v33, %v1498_v32  ;;  %v369_v44 = vor.u32 %v5878_v16, %v365_v28  ;;  %v5919_v45 = vshrl.u32 %v5894_v22, 16  ;;  %v381_v51 = vrot.slane %v5889_v20, 1 }
  0x31   : > { %v1497_v43 = vsel %vm1478_vm3, %v1492_v12, %v1496_v34  ;;  %4894 = vmatprep.mubr.msk.bf16.mxu1 %vm471_vm2, %v366_v35  ;;  %v377_v50 = vor.u32 %v5886_v19, %v373_v39  ;;  %v1507_v52 = vrot.slane %v5911_v40, 2  ;;  %v1504_v53 = vor.u32 %v1503_v37, %v1502_v36 }
  0x32   : > { %5043 = vmatmul.mubr.msk.bf16.gmra.mrb[4].mxu0 %vm471_vm2, %v1497_v43  ;;  %v1501_v49 = vsel %vm1478_vm3, %v1496_v34, %v1500_v38  ;;  %v1506_v55 = vrot.slane %v5919_v45, 1  ;;  %v5930_v56 = vpack.c.bf16 %v275_v42, %v274_v41  ;;  %v5932_v57 = vpack.c.bf16 %v277_v47, %v276_v46  ;;  %v280_v43 = vld [vmem:[%s5781_s21 + $0xc0] sm:$0xff] }
  0x33   : > { %5046 = vmatprep.mubr.msk.bf16.mxu0 %vm471_vm2, %v1501_v49  ;;  %v374_v60 = vsel %vm322_vm1, %v369_v44, %v373_v39  ;;  %v382_v5 = vsel %vm322_vm1, %v377_v50, %v381_v51  ;;  %v1505_v9 = vsel %vm1478_vm3, %v1500_v38, %v1504_v53  ;;  %v5953_v24 = vpack.c.bf16 %v279_v59, %v278_v58  ;;  %v281_v44 = vld [vmem:[%s5781_s21 + $0xc8] sm:$0xff] }
  0x34   : > { %v1508_v61 = vor.u32 %v1507_v52, %v1506_v55  ;;  %v5938_v63 = vshll.u32 %v5930_v56, 16  ;;  %v5941_v1 = vshrl.u32 %v5930_v56, 16  ;;  %v5945_v6 = vshll.u32 %v5932_v57, 16  ;;  %v283_v52 = vld [vmem:[%s5781_s21 + $0xd8] sm:$0xff] }
  0x35   : > { %v5948_v8 = vshrl.u32 %v5932_v57, 16  ;;  %v389_v28 = vrot.slane %v5911_v40, 1  ;;  %v385_v34 = vor.u32 %v5892_v17, %v381_v51  ;;  %v5967_v38 = vshll.u32 %v5953_v24, 16  ;;  %v282_v51 = vld [vmem:[%s5781_s21 + $0xd0] sm:$0xff] }
  0x36   : > { %v1510_v12 = vrot.slane %v5941_v1, 1  ;;  %v1511_v23 = vrot.slane %v5938_v63, 2  ;;  %v1509_v25 = vsel %vm1478_vm3, %v1504_v53, %v1508_v61  ;;  %v1515_v33 = vrot.slane %v5945_v6, 2 }
  0x37   : > { %v1514_v32 = vrot.slane %v5948_v8, 1  ;;  %v393_v35 = vor.u32 %v5919_v45, %v389_v28  ;;  %v397_v36 = vrot.slane %v5938_v63, 1  ;;  %v5970_v39 = vshrl.u32 %v5953_v24, 16 }
  0x38   : > { %4895 = vmatmul.mubr.msk.bf16.gmra.mrb[8].mxu1 %vm471_vm2, %v374_v60  ;;  %v1512_v37 = vor.u32 %v1511_v23, %v1510_v12  ;;  %v390_v42 = vsel %vm322_vm1, %v385_v34, %v389_v28  ;;  %v1519_v50 = vrot.slane %v5967_v38, 2  ;;  %v405_v55 = vrot.slane %v5945_v6, 1 }
  0x39   : > { %4898 = vmatprep.mubr.msk.bf16.mxu1 %vm471_vm2, %v382_v5  ;;  %v1516_v41 = vor.u32 %v1515_v33, %v1514_v32  ;;  %v398_v46 = vsel %vm322_vm1, %v393_v35, %v397_v36  ;;  %v1518_v49 = vrot.slane %v5970_v39, 1  ;;  %v5984_v58 = vpack.c.bf16 %v281_v44, %v280_v43  ;;  %v284_v32 = vld [vmem:[%s5781_s21 + $0xe0] sm:$0xff]  ;;  %v285_v33 = vld [vmem:[%s5781_s21 + $0xe8] sm:$0xff]  ;;  %v287_v43 = vld [vmem:[%s5781_s21 + $0xf8] sm:$0xff] }
  0x3a   : > { %5047 = vmatmul.mubr.msk.bf16.gmra.mrb[8].mxu0 %vm471_vm2, %v1505_v9  ;;  %v1513_v47 = vsel %vm1478_vm3, %v1508_v61, %v1512_v37  ;;  %v401_v59 = vor.u32 %v5941_v1, %v397_v36  ;;  %v409_v60 = vor.u32 %v5948_v8, %v405_v55  ;;  %v413_v61 = vrot.slane %v5967_v38, 1 }
  0x3b   : > { %5050 = vmatprep.mubr.msk.bf16.mxu0 %vm471_vm2, %v1509_v25  ;;  %v1517_v53 = vsel %vm1478_vm3, %v1512_v37, %v1516_v41  ;;  %v5991_v5 = vpack.c.bf16 %v283_v52, %v282_v51  ;;  %v5994_v9 = vor.u32 %v1519_v50, %v1518_v49  ;;  %v1834_v12 = vrot.slane %v5791_v13, 2 }
  0x3c   : > { %v1835_v23 = vrot.slane %v5793_v14, 2  ;;  %v5999_v25 = vshll.u32 %v5984_v58, 16  ;;  %v406_v28 = vsel %vm322_vm1, %v401_v59, %v405_v55  ;;  %v414_v34 = vsel %vm322_vm1, %v409_v60, %v413_v61 }
  0x3d   : > { %7268 = vst [vmem:[#allocation7_spill] sm:$0xff] %v5994_v9  ;;  %v6006_v35 = vshrl.u32 %v5984_v58, 16  ;;  %v6009_v36 = vshll.u32 %v5991_v5, 16  ;;  %v1521_v37 = vsel %vm1478_vm3, %v1516_v41, %v5994_v9  ;;  %v417_v49 = vor.u32 %v5970_v39, %v413_v61  ;;  %v288_v61 = vld [vmem:[%s5781_s21 + $0x100] sm:$0xff]  ;;  %v295_v9 = vld [vmem:[%s5781_s21 + $0x138] sm:$0xff] }
  0x3e   : > { %7269 = vst [vmem:[#allocation8_spill] sm:$0xff] %v5999_v25  ;;  %v1836_v44 = vsel %vm1833_vm4, %v1834_v12, %v1835_v23  ;;  %v1837_v52 = vrot.slane %v5801_v21, 2  ;;  %v6035_v60 = vshrl.u32 %v5991_v5, 16  ;;  %v289_v12 = vld [vmem:[%s5781_s21 + $0x108] sm:$0xff] }
  0x3f   : > { %7270 = vst [vmem:[#allocation9_spill] sm:$0xff] %v6006_v35  ;;  %7271 = vst [vmem:[#allocation10_spill] sm:$0xff] %v6009_v36  ;;  %v429_v50 = vrot.slane %v6009_v36, 1 }
  0x40   : > { %4899 = vmatmul.mubr.msk.bf16.gmra.mrb[12].mxu1 %vm471_vm2, %v390_v42  ;;  %v286_v42 = vld [vmem:[%s5781_s21 + $0xf0] sm:$0xff]  ;;  %7273 = vst [vmem:[#allocation12_spill] sm:$0xff] %v6035_v60 }
  0x41   : > { %4902 = vmatprep.mubr.msk.bf16.mxu1 %vm471_vm2, %v398_v46  ;;  %v421_v46 = vrot.slane %v5999_v25, 1  ;;  %v6025_v51 = vpack.c.bf16 %v287_v43, %v286_v42  ;;  %v291_v42 = vld [vmem:[%s5781_s21 + $0x118] sm:$0xff]  ;;  %v2150_v43 = vsel %vm526_vm0, %v5867_v7, 0 }
  0x42   : > { %5051 = vmatmul.mubr.msk.bf16.gmra.mrb[12].mxu0 %vm471_vm2, %v1513_v47  ;;  %v6018_v47 = vpack.c.bf16 %v285_v33, %v284_v32 }
  0x43   : > { %5054 = vmatprep.mubr.msk.bf16.mxu0 %vm471_vm2, %v1517_v53  ;;  %v425_v41 = vor.u32 %v6006_v35, %v421_v46  ;;  %v1839_v53 = vrot.slane %v5819_v31, 2  ;;  %v422_v59 = vsel %vm322_vm1, %v417_v49, %v421_v46  ;;  %v6044_v33 = vshll.u32 %v6025_v51, 16 }
  0x44   : > { %v6031_v55 = vshll.u32 %v6018_v47, 16  ;;  %v6041_v32 = vshrl.u32 %v6018_v47, 16  ;;  %v6058_v49 = vpack.c.bf16 %v289_v12, %v288_v61 }
  0x45   : > { %7275 = vst [vmem:[#allocation14_spill] sm:$0xff] %v6044_v33 }
  0x46   : > { %7272 = vst [vmem:[#allocation11_spill] sm:$0xff] %v6031_v55  ;;  %7274 = vst [vmem:[#allocation13_spill] sm:$0xff] %v6041_v32  ;;  %v437_v46 = vrot.slane %v6031_v55, 1  ;;  %v6082_v2 = vshll.u32 %v6058_v49, 16  ;;  %v296_v55 = vld [vmem:[%s5781_s21 + $0x140] sm:$0xff] }
  0x48   : > { %4903 = vmatmul.mubr.msk.bf16.gmra.mrb[16].mxu1 %vm471_vm2, %v406_v28  ;;  %v430_v28 = vsel %vm322_vm1, %v425_v41, %v429_v50  ;;  %v294_v41 = vld [vmem:[%s5781_s21 + $0x130] sm:$0xff]  ;;  %v441_v7 = vor.u32 %v6041_v32, %v437_v46  ;;  %7276 = vst [vmem:[#allocation15_spill] sm:$0xff] %v6082_v2  ;;  %v293_v32 = vld [vmem:[%s5781_s21 + $0x128] sm:$0xff] }
  0x49   : > { %4906 = vmatprep.mubr.msk.bf16.mxu1 %vm471_vm2, %v414_v34  ;;  %v6047_v34 = vsel %vm1833_vm4, %v1835_v23, %v1837_v52  ;;  %v433_v23 = vor.u32 %v6035_v60, %v429_v50  ;;  %v1841_v50 = vrot.slane %v5858_v3, 2  ;;  %v6078_v12 = vpack.c.bf16 %v295_v9, %v294_v41 }
  0x4a   : > { %5055 = vmatmul.mubr.msk.bf16.gmra.mrb[16].mxu0 %vm471_vm2, %v1521_v37  ;;  %v290_v37 = vld [vmem:[%s5781_s21 + $0x110] sm:$0xff]  ;;  %v6098_v41 = vshrl.u32 %v6058_v49, 16 }
  0x4b   : > { %5076 = vmatprep.mubr.msk.bf16.mxu0 %vm471_vm2, %v1836_v44  ;;  %v6055_v44 = vsel %vm1833_vm4, %v1837_v52, %v1839_v53  ;;  %v445_v52 = vrot.slane %v6044_v33, 1  ;;  %v6073_v61 = vpack.c.bf16 %v291_v42, %v290_v37  ;;  %v297_v33 = vld [vmem:[%s5781_s21 + $0x148] sm:$0xff]  ;;  %v438_v37 = vsel %vm322_vm1, %v433_v23, %v437_v46 }
  0x4c   : > { %v6090_v42 = vshrl.u32 %v6025_v51, 16  ;;  %v6094_v36 = vpack.c.bf16 %v297_v33, %v296_v55  ;;  %7279 = vst [vmem:[#allocation18_spill] sm:$0xff] %v6098_v41  ;;  %v6104_v25 = vsel %vm1833_vm4, %v1839_v53, %v1841_v50  ;;  %v7252_v46 = vrot.slane %v6078_v12, 2 }
  0x4d   : > { %v446_v9 = vsel %vm322_vm1, %v441_v7, %v445_v52  ;;  %v6101_v60 = vshll.u32 %v6073_v61, 16  ;;  %v453_v33 = vrot.slane %v6082_v2, 1 }
  0x4e   : > { %7277 = vst [vmem:[#allocation16_spill] sm:$0xff] %v6090_v42  ;;  %7278 = vst [vmem:[#allocation17_spill] sm:$0xff] %v6094_v36  ;;  %v2144_v23 = vrot.slane %v6094_v36, 2  ;;  %v449_v35 = vor.u32 %v6090_v42, %v445_v52  ;;  %v2368_v36 = vrot.slane %v5811_v27, 2  ;;  %v1845_v52 = vrot.slane %v5872_v11, 2 }
  0x4f   : > { %7280 = vst [vmem:[#allocation19_spill] sm:$0xff] %v6101_v60  ;;  %v2376_v42 = vrot.slane %v5831_v48, 3 }
  0x50   : > { %4907 = vmatmul.mubr.msk.bf16.gmra.mrb[20].mxu1 %vm471_vm2, %v422_v59  ;;  %v6067_v59 = vld [vmem:[%s7230_s1 + $0x1c] sm:$0x7]  ;;  %v6120_v53 = vsel %vm1833_vm4, %v7252_v46, %v2144_v23  ;;  %v2372_v23 = vrot.slane %v5814_v29, 3  ;;  %v6135_v46 = vshrl.u32 %v6073_v61, 16 }
  0x51   : > { %4910 = vmatprep.mubr.msk.bf16.mxu1 %vm471_vm2, %v430_v28  ;;  %v1843_v28 = vrot.slane %v5860_v4, 2  ;;  %7281 = vst [vmem:[#allocation20_spill] sm:$0xff] %v6120_v53 }
  0x52   : > { %5077 = vmatmul.mubr.msk.bf16.vlgmr.msra.gmra.mrb[0].mxu0 %vm471_vm2, %v6047_v34 }
  0x53   : > { %5113 = vmatpush3.bf16.msra.mxu0 %v2150_v43  ;;  %5080 = vmatprep.mubr.msk.bf16.mxu0 %vm471_vm2, %v6055_v44  ;;  %v292_v43 = vld [vmem:[%s5781_s21 + $0x120] sm:$0xff]  ;;  %v6110_v55 = vsel %vm1833_vm4, %v1841_v50, %v1843_v28  ;;  %v461_v50 = vrot.slane %v6101_v60, 1  ;;  %s4533_s21 = sshll.u32 %s237_s14, 8 }
  0x54   : > { %5524 = vmatprep.subr.msk.bf16.mxu0 %vm526_vm0, %v6067_v59  ;;  %v6113_v7 = vpack.c.bf16 %v293_v32, %v292_v43  ;;  %v2369_v32 = vrot.slane %v5808_v26, 3  ;;  %v1847_v43 = vrot.slane %v5894_v22, 2  ;;  %v454_v26 = vsel %vm322_vm1, %v449_v35, %v453_v33  ;;  %s6752_s22 = scalar_lea.vmem [#allocation2], %s4533_s21 }
  0x55   : > { %s4414_s6 = sshll.u32 %s6752_s22, 4  ;;  %s7175_s6 = int_to_ptr.vmem [resolvable:$true] %s4414_s6 }
  0x56   : > { %v6138_v60 = vshll.u32 %v6113_v7, 16  ;;  %v2370_v27 = vor.u32 %v2369_v32, %v2368_v36  ;;  %v6152_v36 = vsel %vm1833_vm4, %v1845_v52, %v1847_v43  ;;  %s5587_s10 = scalar_lea.vmem %s7175_s6, 4096  ;;  %p5594_p1 = scmp.lt.s32.totalorder %s7175_s6, %s5592_s12 }
  0x57   : > { %p5588_p12 = scmp.ne.s32.totalorder %s7175_s6, %s5587_s10  ;;  %p5595_p2 = scmp.lt.s32.totalorder %s5593_s13, %s5587_s10 }
  0x58   : > { %4911 = vmatmul.mubr.msk.bf16.gmra.mrb[24].mxu1 %vm471_vm2, %v438_v37  ;;  %v457_v37 = vor.u32 %v6098_v41, %v453_v33  ;;  %v2375_v41 = vrot.slane %v5839_v54, 2  ;;  %v465_v54 = vor.u32 %v6135_v46, %v461_v50  ;;  %v469_v48 = vrot.slane %v6138_v60, 1 }
  0x59   : > { %4914 = vmatprep.mubr.msk.bf16.mxu1 %vm471_vm2, %v446_v9  ;;  %v2371_v9 = vrot.slane %v5817_v30, 2  ;;  %v6145_v30 = vsel %vm1833_vm4, %v1843_v28, %v1845_v52  ;;  %v1849_v28 = vrot.slane %v5930_v56, 2  ;;  %v1851_v33 = vrot.slane %v5932_v57, 2  ;;  %p5589_p13 = pnand %p5588_p12, %p5736_p4  ;;  %p5596_p3 = por %p5595_p2, %p5594_p1 }
  0x5a   : > { %5081 = vmatmul.mubr.msk.bf16.gmra.mrb[4].mxu0 %vm471_vm2, %v6104_v25  ;;  %v462_v53 = vsel %vm322_vm1, %v457_v37, %v461_v50  ;;  %v2377_v0 = vor.u32 %v2376_v42, %v2375_v41  ;;  %v2379_v42 = vrot.slane %v5878_v16, 2  ;;  %v2380_v41 = vrot.slane %v5875_v15, 3 }
  0x5b   : > { %5084 = vmatprep.mubr.msk.bf16.mxu0 %vm471_vm2, %v6110_v55  ;;  %v2373_v2 = vor.u32 %v2372_v23, %v2371_v9  ;;  %v2384_v50 = vrot.slane %v5881_v18, 3  ;;  %v6172_v32 = vsel %vm1833_vm4, %v1847_v43, %v1849_v28  ;;  %v6179_v16 = vsel %vm1833_vm4, %v1849_v28, %v1851_v33  ;;  %p5590_p0 = pneg %p5589_p13 }
  0x5c   : > { %v2381_v37 = vor.u32 %v2380_v41, %v2379_v42  ;;  %v1853_v43 = vrot.slane %v5953_v24, 2  ;;  %v1855_v9 = vrot.slane %v5984_v58, 2  ;;  %v2396_v42 = vrot.slane %v5938_v63, 3 }
  0x5d   : > { %v6148_v29 = vsel %vm2367_vm5, %v2370_v27, %v2373_v2  ;;  %v6158_v35 = vsel %vm2367_vm5, %v2373_v2, %v2377_v0  ;;  %v2383_v2 = vrot.slane %v5886_v19, 2  ;;  %v2387_v19 = vrot.slane %v5892_v17, 2  ;;  %v6207_v17 = vld [vmem:[%s7230_s1 + $0xc] sm:$0x7]  ;;  %p5597_p5 = pnand %p5596_p3, %p5590_p0 }
  0x5e   : > { %v6175_v52 = vsel %vm2367_vm5, %v2377_v0, %v2381_v37  ;;  %v2388_v0 = vrot.slane %v5889_v20, 3  ;;  %v2391_v27 = vrot.slane %v5919_v45, 2  ;;  %v6202_v20 = vsel %vm1833_vm4, %v1851_v33, %v1853_v43 }
  0x5f   : > { %v2385_v15 = vor.u32 %v2384_v50, %v2383_v2  ;;  %v2395_v45 = vrot.slane %v5941_v1, 2  ;;  %v1857_v41 = vrot.slane %v5991_v5, 2  ;;  %v1859_v33 = vrot.slane %v6018_v47, 2 }
  0x60   : > { %4915 = vmatmul.mubr.msk.bf16.gmra.mrb[28].mxu1 %vm471_vm2, %v454_v26  ;;  %v2389_v23 = vor.u32 %v2388_v0, %v2387_v19  ;;  %v2392_v26 = vrot.slane %v5911_v40, 3  ;;  %v6212_v40 = vsel %vm1833_vm4, %v1853_v43, %v1855_v9  ;;  %v2400_v2 = vrot.slane %v5945_v6, 3 }
  0x61   : > { %4918 = vmatprep.mubr.msk.bf16.mxu1 %vm471_vm2, %v462_v53  ;;  %v470_v53 = vsel %vm322_vm1, %v465_v54, %v469_v48  ;;  %v6186_v18 = vsel %vm2367_vm5, %v2381_v37, %v2385_v15  ;;  %v1037_v54 = vsel %vm526_vm0, %v5852_v62, 0  ;;  %v2399_v37 = vrot.slane %v5948_v8, 2 }
  0x62   : > { %5085 = vmatmul.mubr.msk.bf16.gmra.mrb[8].mxu0 %vm471_vm2, %v6145_v30  ;;  %v6199_v48 = vsel %vm2367_vm5, %v2385_v15, %v2389_v23  ;;  %v2393_v28 = vor.u32 %v2392_v26, %v2391_v27  ;;  %v6235_v15 = vsel %vm1833_vm4, %v1855_v9, %v1857_v41  ;;  %v6240_v63 = vsel %vm1833_vm4, %v1857_v41, %v1859_v33 }
  0x63   : > { %5088 = vmatprep.mubr.msk.bf16.mxu0 %vm471_vm2, %v6152_v36  ;;  %v2401_v1 = vor.u32 %v2400_v2, %v2399_v37  ;;  %v2403_v6 = vrot.slane %v5970_v39, 2  ;;  %v2404_v19 = vrot.slane %v5967_v38, 3  ;;  %v1861_v0 = vrot.slane %v6025_v51, 2 }
  0x64   : > { %v6217_v62 = vsel %vm2367_vm5, %v2389_v23, %v2393_v28  ;;  %v1863_v43 = vrot.slane %v6058_v49, 2  ;;  %v1865_v39 = vrot.slane %v6073_v61, 2  ;;  %v1867_v26 = vrot.slane %v6113_v7, 2 }
  0x65   : > { %v6255_v9 = vor.u32 %v2404_v19, %v2403_v6  ;;  %v6262_v27 = vsel %vm1833_vm4, %v1859_v33, %v1861_v0  ;;  %v2503_v41 = vsel %vm526_vm0, %v6067_v59, 0  ;;  %v6313_v33 = vld [vmem:[%s7230_s1 + $0x20] sm:$0x7]  ;;  %v948_v59 = vrot.slane %v5793_v14, 1 }
  0x66   : > { %v6267_v38 = vsel %vm1833_vm4, %v1861_v0, %v1863_v43  ;;  %v964_v19 = vrot.slane %v5932_v57, 1  ;;  %v966_v0 = vrot.slane %v5953_v24, 1 }
  0x67   : > { %v6259_v23 = vsel %vm2367_vm5, %v2401_v1, %v6255_v9 }
  0x68   : > { %4919 = vmatmul.mubr.msk.bf16.gmra.mrb[32].mxu1 %vm471_vm2, %v470_v53  ;;  %v2397_v53 = vor.u32 %v2396_v42, %v2395_v45  ;;  %v7282_v45 = vrot.slane %v6078_v12, 2 }
  0x69   : > { %4924 = vmatprep.mubr.msk.bf16.mxu1 %vm471_vm2, %v5787_v10 }
  0x6a   : > { %5089 = vmatmul.mubr.msk.bf16.gmra.mrb[12].mxu0 %vm471_vm2, %v6172_v32  ;;  %v6232_v50 = vsel %vm2367_vm5, %v2393_v28, %v2397_v53  ;;  %v6245_v8 = vsel %vm2367_vm5, %v2397_v53, %v2401_v1  ;;  %v6283_v28 = vsel %vm1833_vm4, %v1865_v39, %v1867_v26  ;;  %v6294_v42 = vsel %vm1833_vm4, %v1867_v26, %v7282_v45 }
  0x6b   : > { %5092 = vmatprep.mubr.msk.bf16.mxu0 %vm471_vm2, %v6179_v16  ;;  %v958_v53 = vrot.slane %v5872_v11, 1  ;;  %v962_v1 = vrot.slane %v5930_v56, 1  ;;  %v1553_v26 = vshrl.u32 %v6078_v12, 16  ;;  %v970_v45 = vrot.slane %v5991_v5, 1 }
  0x70   : > { %4925 = vmatmul.mubr.msk.bf16.vlgmr.msra.gmra.mrb[0].mxu1 %vm471_vm2, %v5791_v13 }
  0x71   : > { %4928 = vmatprep.mubr.msk.bf16.mxu1 %vm471_vm2, %v5793_v14  ;;  %4961 = vmatpush3.bf16.msra.mxu1 %v1037_v54  ;;  %v6278_v54 = vsel %vm1833_vm4, %v1863_v43, %v1865_v39  ;;  %v6418_v43 = vsel %vm944_vm6, %v962_v1, %v964_v19  ;;  %v968_v39 = vrot.slane %v5984_v58, 1 }
  0x72   : > { %5093 = vmatmul.mubr.msk.bf16.gmra.mrb[16].mxu0 %vm471_vm2, %v6202_v20  ;;  %5519 = vmatprep.subr.msk.bf16.mxu1 %vm526_vm0, %v6207_v17 }
  0x73   : > { %5096 = vmatprep.mubr.msk.bf16.mxu0 %vm471_vm2, %v6212_v40 }
  0x78   : > { %4929 = vmatmul.mubr.msk.bf16.gmra.mrb[4].mxu1 %vm471_vm2, %v5801_v21 }
  0x79   : > { %4932 = vmatprep.mubr.msk.bf16.mxu1 %vm471_vm2, %v5819_v31 }
  0x7a   : > { %5097 = vmatmul.mubr.msk.bf16.gmra.mrb[20].mxu0 %vm471_vm2, %v6235_v15 }
  0x7b   : > { %5100 = vmatprep.mubr.msk.bf16.mxu0 %vm471_vm2, %v6240_v63 }
  0x80   : > { %4933 = vmatmul.mubr.msk.bf16.gmra.mrb[8].mxu1 %vm471_vm2, %v5858_v3 }
  0x81   : > { %4936 = vmatprep.mubr.msk.bf16.mxu1 %vm471_vm2, %v5860_v4 }
  0x82   : > { %5101 = vmatmul.mubr.msk.bf16.gmra.mrb[24].mxu0 %vm471_vm2, %v6262_v27 }
  0x83   : > { %5104 = vmatprep.mubr.msk.bf16.mxu0 %vm471_vm2, %v6267_v38 }
  0x88   : > { %4937 = vmatmul.mubr.msk.bf16.gmra.mrb[12].mxu1 %vm471_vm2, %v5872_v11 }
  0x89   : > { %4940 = vmatprep.mubr.msk.bf16.mxu1 %vm471_vm2, %v5894_v22 }
  0x8a   : > { %5105 = vmatmul.mubr.msk.bf16.gmra.mrb[28].mxu0 %vm471_vm2, %v6278_v54 }
  0x8b   : > { %5108 = vmatprep.mubr.msk.bf16.mxu0 %vm471_vm2, %v6283_v28 }
  0x90   : > { %4941 = vmatmul.mubr.msk.bf16.gmra.mrb[16].mxu1 %vm471_vm2, %v5930_v56 }
  0x91   : > { %4944 = vmatprep.mubr.msk.bf16.mxu1 %vm471_vm2, %v5932_v57 }
  0x92   : > { %5109 = vmatmul.mubr.msk.bf16.gmra.mrb[32].mxu0 %vm471_vm2, %v6294_v42 }
  0x93   : > { %5114 = vmatprep.mubr.msk.bf16.mxu0 %vm471_vm2, %v6047_v34  ;;  %v946_v34 = vrot.slane %v5791_v13, 1 }
  0x95   : > { %v6350_v13 = vsel %vm944_vm6, %v946_v34, %v948_v59 }
  0x98   : > { %4945 = vmatmul.mubr.msk.bf16.gmra.mrb[20].mxu1 %vm471_vm2, %v5953_v24 }
  0x99   : > { %4948 = vmatprep.mubr.msk.bf16.mxu1 %vm471_vm2, %v5984_v58 }
  0x9a   : > { %5115 = vmatmul.mubr.msk.bf16.vlgmr.msra.gmra.mrb[0].mxu0 %vm471_vm2, %v6055_v44 }
  0x9b   : > { %5151 = vmatpush3.bf16.msra.mxu0 %v2503_v41  ;;  %5118 = vmatprep.mubr.msk.bf16.mxu0 %vm471_vm2, %v6104_v25  ;;  %v945_v25 = vrot.slane %v5787_v10, 1  ;;  %v950_v10 = vrot.slane %v5801_v21, 1  ;;  %v1549_v41 = vrot.slane %v6138_v60, 2 }
  0x9c   : > { %5525 = vmatprep.subr.msk.bf16.mxu0 %vm526_vm0, %v6313_v33 }
  0x9d   : > { %v947_v44 = vsel %vm944_vm6, %v945_v25, %v946_v34  ;;  %v1555_v25 = vrot.slane %v1553_v26, 1 }
  0xa0   : > { %4949 = vmatmul.mubr.msk.bf16.gmra.mrb[24].mxu1 %vm471_vm2, %v5991_v5 }
  0xa1   : > { %4952 = vmatprep.mubr.msk.bf16.mxu1 %vm471_vm2, %v6018_v47 }
  0xa2   : > { %5119 = vmatmul.mubr.msk.bf16.gmra.mrb[4].mxu0 %vm471_vm2, %v6110_v55  ;;  %v6353_v55 = vsel %vm944_vm6, %v948_v59, %v950_v10  ;;  %v6446_v59 = vsel %vm944_vm6, %v966_v0, %v968_v39 }
  0xa3   : > { %5122 = vmatprep.mubr.msk.bf16.mxu0 %vm471_vm2, %v6145_v30  ;;  %v1261_v30 = vsel %vm526_vm0, %v6207_v17, 0 }
  0xa8   : > { %4953 = vmatmul.mubr.msk.bf16.gmra.mrb[28].mxu1 %vm471_vm2, %v6025_v51 }
  0xa9   : > { %4956 = vmatprep.mubr.msk.bf16.mxu1 %vm471_vm2, %v6058_v49 }
  0xaa   : > { %5123 = vmatmul.mubr.msk.bf16.gmra.mrb[8].mxu0 %vm471_vm2, %v6152_v36  ;;  %v952_v36 = vrot.slane %v5819_v31, 1 }
  0xab   : > { %5126 = vmatprep.mubr.msk.bf16.mxu0 %vm471_vm2, %v6172_v32  ;;  %v954_v32 = vrot.slane %v5858_v3, 1 }
  0xad   : > { %v6373_v17 = vsel %vm944_vm6, %v952_v36, %v954_v32 }
  0xb0   : > { %4957 = vmatmul.mubr.msk.bf16.gmra.mrb[32].mxu1 %vm471_vm2, %v6073_v61 }
  0xb1   : > { %4962 = vmatprep.mubr.msk.bf16.mxu1 %vm471_vm2, %v947_v44 }
  0xb2   : > { %5127 = vmatmul.mubr.msk.bf16.gmra.mrb[12].mxu0 %vm471_vm2, %v6179_v16  ;;  %v7283_v16 = vld [vmem:[#allocation5_spill] sm:$0xff] }
  0xb3   : > { %5130 = vmatprep.mubr.msk.bf16.mxu0 %vm471_vm2, %v6202_v20  ;;  %v6370_v20 = vsel %vm944_vm6, %v950_v10, %v952_v36 }
  0xb8   : > { %4963 = vmatmul.mubr.msk.bf16.vlgmr.msra.gmra.mrb[0].mxu1 %vm471_vm2, %v6350_v13 }
  0xb9   : > { %4966 = vmatprep.mubr.msk.bf16.mxu1 %vm471_vm2, %v6353_v55  ;;  %4999 = vmatpush3.bf16.msra.mxu1 %v1261_v30  ;;  %v6449_v30 = vsel %vm944_vm6, %v968_v39, %v970_v45 }
  0xba   : > { %5131 = vmatmul.mubr.msk.bf16.gmra.mrb[16].mxu0 %vm471_vm2, %v6212_v40  ;;  %5521 = vmatprep.subr.msk.bf16.mxu1 %vm526_vm0, %v7283_v16  ;;  %v956_v40 = vrot.slane %v5860_v4, 1  ;;  %v974_v16 = vrot.slane %v6025_v51, 1 }
  0xbb   : > { %5134 = vmatprep.mubr.msk.bf16.mxu0 %vm471_vm2, %v6235_v15  ;;  %v960_v15 = vrot.slane %v5894_v22, 1 }
  0xbc   : > { %v6386_v37 = vsel %vm944_vm6, %v954_v32, %v956_v40  ;;  %v6389_v2 = vsel %vm944_vm6, %v956_v40, %v958_v53  ;;  %v972_v32 = vrot.slane %v6018_v47, 1 }
  0xbd   : > { %v6405_v6 = vsel %vm944_vm6, %v960_v15, %v962_v1  ;;  %v7262_v1 = vrot.slane %v6113_v7, 1 }
  0xbe   : > { %v6468_v40 = vsel %vm944_vm6, %v970_v45, %v972_v32 }
  0xc0   : > { %4967 = vmatmul.mubr.msk.bf16.gmra.mrb[4].mxu1 %vm471_vm2, %v6370_v20 }
  0xc1   : > { %4970 = vmatprep.mubr.msk.bf16.mxu1 %vm471_vm2, %v6373_v17 }
  0xc2   : > { %5135 = vmatmul.mubr.msk.bf16.gmra.mrb[20].mxu0 %vm471_vm2, %v6240_v63  ;;  %v6402_v63 = vsel %vm944_vm6, %v958_v53, %v960_v15  ;;  %v6471_v53 = vsel %vm944_vm6, %v972_v32, %v974_v16 }
  0xc3   : > { %5138 = vmatprep.mubr.msk.bf16.mxu0 %vm471_vm2, %v6262_v27  ;;  %v6421_v27 = vsel %vm944_vm6, %v964_v19, %v966_v0  ;;  %v7286_v0 = vld [vmem:[#allocation8_spill] sm:$0xff] }
  0xc4   : > { %v2408_v39 = vrot.slane %v7286_v0, 3 }
  0xc8   : > { %4971 = vmatmul.mubr.msk.bf16.gmra.mrb[8].mxu1 %vm471_vm2, %v6386_v37 }
  0xc9   : > { %4974 = vmatprep.mubr.msk.bf16.mxu1 %vm471_vm2, %v6389_v2 }
  0xca   : > { %5139 = vmatmul.mubr.msk.bf16.gmra.mrb[24].mxu0 %vm471_vm2, %v6267_v38  ;;  %v1546_v38 = vshrl.u32 %v6113_v7, 16 }
  0xcb   : > { %5142 = vmatprep.mubr.msk.bf16.mxu0 %vm471_vm2, %v6278_v54  ;;  %v7263_v54 = vshll.u32 %v6078_v12, 16 }
  0xcd   : > { %v1558_v34 = vrot.slane %v7263_v54, 2 }
  0xcf   : > { %v1559_v10 = vor.u32 %v1558_v34, %v1555_v25  ;;  %v7289_v34 = vld [vmem:[#allocation13_spill] sm:$0xff] }
  0xd0   : > { %4975 = vmatmul.mubr.msk.bf16.gmra.mrb[12].mxu1 %vm471_vm2, %v6402_v63 }
  0xd1   : > { %4978 = vmatprep.mubr.msk.bf16.mxu1 %vm471_vm2, %v6405_v6 }
  0xd2   : > { %5143 = vmatmul.mubr.msk.bf16.gmra.mrb[28].mxu0 %vm471_vm2, %v6283_v28  ;;  %v7284_v28 = vld [vmem:[#allocation20_spill] sm:$0xff] }
  0xd3   : > { %5146 = vmatprep.mubr.msk.bf16.mxu0 %vm471_vm2, %v6294_v42  ;;  %v1548_v42 = vrot.slane %v1546_v38, 1 }
  0xd5   : > { %v6443_v44 = vor.u32 %v1549_v41, %v1548_v42  ;;  %v7288_v42 = vld [vmem:[#allocation10_spill] sm:$0xff] }
  0xd6   : > { %v2412_v41 = vrot.slane %v7288_v42, 3 }
  0xd7   : > { %v6453_v36 = vsel %vm1478_vm3, %v6443_v44, %v1559_v10  ;;  %v2415_v10 = vrot.slane %v7289_v34, 2 }
  0xd8   : > { %4979 = vmatmul.mubr.msk.bf16.gmra.mrb[16].mxu1 %vm471_vm2, %v6418_v43 }
  0xd9   : > { %4982 = vmatprep.mubr.msk.bf16.mxu1 %vm471_vm2, %v6421_v27 }
  0xda   : > { %5147 = vmatmul.mubr.msk.bf16.gmra.mrb[32].mxu0 %vm471_vm2, %v7284_v28  ;;  %v7287_v28 = vld [vmem:[#allocation12_spill] sm:$0xff] }
  0xdb   : > { %5152 = vmatprep.mubr.msk.bf16.mxu0 %vm471_vm2, %v6148_v29  ;;  %v2813_v29 = vsel %vm526_vm0, %v6313_v33, 0  ;;  %v978_v33 = vrot.slane %v6073_v61, 1  ;;  %v2411_v45 = vrot.slane %v7287_v28, 2 }
  0xe0   : > { %4983 = vmatmul.mubr.msk.bf16.gmra.mrb[20].mxu1 %vm471_vm2, %v6446_v59 }
  0xe1   : > { %4986 = vmatprep.mubr.msk.bf16.mxu1 %vm471_vm2, %v6449_v30 }
  0xe2   : > { %5153 = vmatmul.mubr.msk.bf16.vlgmr.msra.gmra.mrb[0].mxu0 %vm471_vm2, %v6158_v35  ;;  %v976_v35 = vrot.slane %v6058_v49, 1 }
  0xe3   : > { %5189 = vmatpush3.bf16.msra.mxu0 %v2813_v29  ;;  %5156 = vmatprep.mubr.msk.bf16.mxu0 %vm471_vm2, %v6175_v52  ;;  %v7290_v29 = vld [vmem:[#allocation11_spill] sm:$0xff] }
  0xe4   : > { %v6484_v52 = vsel %vm944_vm6, %v974_v16, %v976_v35  ;;  %v6487_v15 = vsel %vm944_vm6, %v976_v35, %v978_v33  ;;  %v2416_v32 = vrot.slane %v7290_v29, 3  ;;  %v7291_v16 = vld [vmem:[#allocation16_spill] sm:$0xff] }
  0xe5   : > { %v2419_v35 = vrot.slane %v7291_v16, 2 }
  0xe8   : > { %4987 = vmatmul.mubr.msk.bf16.gmra.mrb[24].mxu1 %vm471_vm2, %v6468_v40 }
  0xe9   : > { %4990 = vmatprep.mubr.msk.bf16.mxu1 %vm471_vm2, %v6471_v53 }
  0xea   : > { %5157 = vmatmul.mubr.msk.bf16.gmra.mrb[4].mxu0 %vm471_vm2, %v6186_v18  ;;  %v6501_v18 = vsel %vm944_vm6, %v978_v33, %v7262_v1 }
  0xeb   : > { %5160 = vmatprep.mubr.msk.bf16.mxu0 %vm471_vm2, %v6199_v48  ;;  %v7285_v48 = vld [vmem:[#allocation9_spill] sm:$0xff] }
  0xec   : > { %v2407_v19 = vrot.slane %v7285_v48, 2 }
  0xf0   : > { %4991 = vmatmul.mubr.msk.bf16.gmra.mrb[28].mxu1 %vm471_vm2, %v6484_v52 }
  0xf1   : > { %4994 = vmatprep.mubr.msk.bf16.mxu1 %vm471_vm2, %v6487_v15 }
  0xf2   : > { %5161 = vmatmul.mubr.msk.bf16.gmra.mrb[8].mxu0 %vm471_vm2, %v6217_v62  ;;  %v2409_v62 = vor.u32 %v2408_v39, %v2407_v19 }
  0xf3   : > { %5164 = vmatprep.mubr.msk.bf16.mxu0 %vm471_vm2, %v6232_v50  ;;  %v2413_v50 = vor.u32 %v2412_v41, %v2411_v45  ;;  %v7295_v41 = vld [vmem:[#allocation15_spill] sm:$0xff] }
  0xf4   : > { %v2410_v25 = vsel %vm2367_vm5, %v6255_v9, %v2409_v62  ;;  %v2417_v9 = vor.u32 %v2416_v32, %v2415_v10  ;;  %v2432_v32 = vrot.slane %v6138_v60, 3  ;;  %v7298_v60 = vld [vmem:[#allocation17_spill] sm:$0xff] }
  0xf6   : > { %v2418_v39 = vsel %vm2367_vm5, %v2413_v50, %v2417_v9 }
  0xf8   : > { %4995 = vmatmul.mubr.msk.bf16.gmra.mrb[32].mxu1 %vm471_vm2, %v6501_v18 }
  0xf9   : > { %5000 = vmatprep.mubr.msk.bf16.mxu1 %vm471_vm2, %v6350_v13  ;;  %v2414_v13 = vsel %vm2367_vm5, %v2409_v62, %v2413_v50  ;;  %v2424_v62 = vrot.slane %v7295_v41, 3 }
  0xfa   : > { %5165 = vmatmul.mubr.msk.bf16.gmra.mrb[12].mxu0 %vm471_vm2, %v6245_v8  ;;  %v7292_v8 = vld [vmem:[#allocation14_spill] sm:$0xff] }
  0xfb   : > { %5168 = vmatprep.mubr.msk.bf16.mxu0 %vm471_vm2, %v6259_v23  ;;  %v2420_v33 = vrot.slane %v7292_v8, 3  ;;  %v7293_v23 = vld [vmem:[#allocation6_spill] sm:$0xff] }
  0xfd   : > { %v2421_v19 = vor.u32 %v2420_v33, %v2419_v35  ;;  %v7297_v35 = vshll.u32 %v6078_v12, 16 }
  0xff   : > { %v2422_v1 = vsel %vm2367_vm5, %v2417_v9, %v2421_v19 }
 0x100   : > { %5001 = vmatmul.mubr.msk.bf16.vlgmr.msra.gmra.mrb[0].mxu1 %vm471_vm2, %v6353_v55  ;;  %v7294_v55 = vld [vmem:[#allocation18_spill] sm:$0xff] }
 0x101   : > { %5004 = vmatprep.mubr.msk.bf16.mxu1 %vm471_vm2, %v6370_v20  ;;  %5227 = vmatpush3.bf16.msra.mxu1 %v7293_v23  ;;  %v2423_v45 = vrot.slane %v7294_v55, 2  ;;  %v2427_v20 = vrot.slane %v6135_v46, 2  ;;  %v7296_v23 = vld [vmem:[#allocation19_spill] sm:$0xff] }
 0x102   : > { %5169 = vmatmul.mubr.msk.bf16.gmra.mrb[16].mxu0 %vm471_vm2, %v2410_v25  ;;  %v2428_v54 = vrot.slane %v7296_v23, 3 }
 0x103   : > { %5172 = vmatprep.mubr.msk.bf16.mxu0 %vm471_vm2, %v2414_v13  ;;  %v2425_v50 = vor.u32 %v2424_v62, %v2423_v45  ;;  %v2721_v45 = vrot.slane %v5793_v14, 3  ;;  %v2722_v62 = vrot.slane %v5801_v21, 3  ;;  %v2726_v14 = vrot.slane %v5858_v3, 3 }
 0x104   : > { %v2429_v25 = vor.u32 %v2428_v54, %v2427_v20  ;;  %v2440_v54 = vshrl.u32 %v7298_v60, 16 }
 0x105   : > { %v2426_v10 = vsel %vm2367_vm5, %v2421_v19, %v2425_v50 }
 0x106   : > { %v2430_v13 = vsel %vm2367_vm5, %v2425_v50, %v2429_v25  ;;  %v2442_v19 = vrot.slane %v2440_v54, 2  ;;  %v1523_v50 = vrot.slane %v7286_v0, 2  ;;  %v7299_v0 = vrot.slane %v6113_v7, 1 }
 0x108   : > { %5005 = vmatmul.mubr.msk.bf16.gmra.mrb[4].mxu1 %vm471_vm2, %v6373_v17  ;;  %v2431_v17 = vrot.slane %v1546_v38, 2 }
 0x109   : > { %5008 = vmatprep.mubr.msk.bf16.mxu1 %vm471_vm2, %v6386_v37  ;;  %v2435_v37 = vrot.slane %v1553_v26, 2 }
 0x10a   : > { %5173 = vmatmul.mubr.msk.bf16.gmra.mrb[20].mxu0 %vm471_vm2, %v2418_v39  ;;  %v2433_v38 = vor.u32 %v2432_v32, %v2431_v17  ;;  %v1527_v17 = vrot.slane %v7288_v42, 2  ;;  %v2740_v42 = vrot.slane %v5984_v58, 3 }
 0x10b   : > { %5176 = vmatprep.mubr.msk.bf16.mxu0 %vm471_vm2, %v2422_v1  ;;  %v2436_v1 = vrot.slane %v7297_v35, 3 }
 0x10c   : > { %v2434_v9 = vsel %vm2367_vm5, %v2429_v25, %v2433_v38 }
 0x10d   : > { %v2437_v33 = vor.u32 %v2436_v1, %v2435_v37  ;;  %v1531_v37 = vrot.slane %v7290_v29, 2  ;;  %v1534_v1 = vrot.slane %v7291_v16, 1 }
 0x10f   : > { %v2438_v39 = vsel %vm2367_vm5, %v2433_v38, %v2437_v33  ;;  %v1535_v38 = vrot.slane %v7292_v8, 2  ;;  %v2744_v8 = vrot.slane %v6018_v47, 3  ;;  %v2748_v47 = vrot.slane %v6058_v49, 3 }
 0x110   : > { %5009 = vmatmul.mubr.msk.bf16.gmra.mrb[8].mxu1 %vm471_vm2, %v6389_v2  ;;  %v2443_v2 = vshll.u32 %v7298_v60, 16  ;;  %v2752_v49 = vrot.slane %v6113_v7, 3 }
 0x111   : > { %5012 = vmatprep.mubr.msk.bf16.mxu1 %vm471_vm2, %v6402_v63 }
 0x112   : > { %5177 = vmatmul.mubr.msk.bf16.gmra.mrb[24].mxu0 %vm471_vm2, %v2426_v10  ;;  %v2445_v26 = vrot.slane %v2443_v2, 3  ;;  %v1526_v10 = vrot.slane %v7287_v28, 1  ;;  %v1538_v2 = vrot.slane %v7294_v55, 1  ;;  %v2746_v55 = vrot.slane %v6025_v51, 3 }
 0x113   : > { %5180 = vmatprep.mubr.msk.bf16.mxu0 %vm471_vm2, %v2430_v13  ;;  %v1530_v13 = vrot.slane %v7289_v34, 1  ;;  %v2742_v34 = vrot.slane %v5991_v5, 3  ;;  %v1536_v5 = vor.u32 %v1535_v38, %v1534_v1  ;;  %v2750_v51 = vrot.slane %v6073_v61, 3 }
 0x114   : > { %v2446_v63 = vor.u32 %v2445_v26, %v2442_v19  ;;  %v1542_v19 = vrot.slane %v6135_v46, 1  ;;  %v1543_v26 = vrot.slane %v7296_v23, 2  ;;  %v2754_v61 = vrot.slane %v6078_v12, 3 }
 0x115   : > { %v1532_v28 = vor.u32 %v1531_v37, %v1530_v13  ;;  %v2743_v58 = vsel %vm2720_vm7, %v2740_v42, %v2742_v34 }
 0x116   : > { %v2447_v20 = vsel %vm2367_vm5, %v2437_v33, %v2446_v63  ;;  %v1539_v33 = vrot.slane %v7295_v41, 2  ;;  %v2745_v63 = vsel %vm2720_vm7, %v2742_v34, %v2744_v8 }
 0x117   : > { %v1537_v41 = vsel %vm1478_vm3, %v1532_v28, %v1536_v5 }
 0x118   : > { %5013 = vmatmul.mubr.msk.bf16.gmra.mrb[12].mxu1 %vm471_vm2, %v6405_v6  ;;  %v2723_v6 = vsel %vm2720_vm7, %v2721_v45, %v2722_v62  ;;  %v1540_v16 = vor.u32 %v1539_v33, %v1538_v2  ;;  %v2747_v45 = vsel %vm2720_vm7, %v2744_v8, %v2746_v55 }
 0x119   : > { %5016 = vmatprep.mubr.msk.bf16.mxu1 %vm471_vm2, %v6418_v43  ;;  %v2724_v43 = vrot.slane %v5819_v31, 3  ;;  %v2730_v31 = vrot.slane %v5872_v11, 3  ;;  %v1522_v11 = vrot.slane %v7285_v48, 1  ;;  %v2738_v48 = vrot.slane %v5953_v24, 3 }
 0x11a   : > { %5181 = vmatmul.mubr.msk.bf16.gmra.mrb[28].mxu0 %vm471_vm2, %v2434_v9  ;;  %v1528_v24 = vor.u32 %v1527_v17, %v1526_v10  ;;  %v3190_v17 = vlaneseq }
 0x11b   : > { %5184 = vmatprep.mubr.msk.bf16.mxu0 %vm471_vm2, %v2438_v39  ;;  %v2725_v21 = vsel %vm2720_vm7, %v2722_v62, %v2724_v43  ;;  %v2741_v9 = vsel %vm2720_vm7, %v2738_v48, %v2740_v42  ;;  %v1541_v39 = vsel %vm1478_vm3, %v1536_v5, %v1540_v16  ;;  %v1544_v62 = vor.u32 %v1543_v26, %v1542_v19 }
 0x11c   : > { %v1533_v54 = vsel %vm1478_vm3, %v1528_v24, %v1532_v28 }
 0x11d   : > { %v1545_v46 = vsel %vm1478_vm3, %v1540_v16, %v1544_v62  ;;  %v1551_v23 = vsel %vm1478_vm3, %v1544_v62, %v6443_v44  ;;  %v2755_v44 = vsel %vm2720_vm7, %v2752_v49, %v2754_v61 }
 0x120   : > { %5017 = vmatmul.mubr.msk.bf16.gmra.mrb[16].mxu1 %vm471_vm2, %v6421_v27  ;;  %v2727_v27 = vsel %vm2720_vm7, %v2724_v43, %v2726_v14  ;;  %v2753_v43 = vsel %vm2720_vm7, %v2750_v51, %v2752_v49 }
 0x121   : > { %5020 = vmatprep.mubr.msk.bf16.mxu1 %vm471_vm2, %v6446_v59  ;;  %v2728_v59 = vrot.slane %v5860_v4, 3  ;;  %v2734_v4 = vrot.slane %v5930_v56, 3  ;;  %v2736_v56 = vrot.slane %v5932_v57, 3 }
 0x122   : > { %5185 = vmatmul.mubr.msk.bf16.gmra.mrb[32].mxu0 %vm471_vm2, %v2447_v20  ;;  %v2749_v20 = vsel %vm2720_vm7, %v2746_v55, %v2748_v47 }
 0x123   : > { %5190 = vmatprep.mubr.msk.bf16.mxu0 %vm471_vm2, %v2723_v6  ;;  %v2729_v3 = vsel %vm2720_vm7, %v2726_v14, %v2728_v59  ;;  %v2737_v35 = vsel %vm2720_vm7, %v2734_v4, %v2736_v56  ;;  %v2739_v57 = vsel %vm2720_vm7, %v2736_v56, %v2738_v48  ;;  %v2751_v6 = vsel %vm2720_vm7, %v2748_v47, %v2750_v51 }
 0x124   : > { %v2756_v14 = vrot.slane %v7298_v60, 3 }
 0x128   : > { %5021 = vmatmul.mubr.msk.bf16.gmra.mrb[20].mxu1 %vm471_vm2, %v6449_v30  ;;  %v2731_v30 = vsel %vm2720_vm7, %v2728_v59, %v2730_v31 }
 0x129   : > { %5024 = vmatprep.mubr.msk.bf16.mxu1 %vm471_vm2, %v6468_v40  ;;  %v2732_v40 = vrot.slane %v5894_v22, 3  ;;  %v1524_v22 = vor.u32 %v1523_v50, %v1522_v11 }
 0x12a   : > { %5191 = vmatmul.mubr.msk.bf16.vlgmr.msra.gmra.mrb[0].mxu0 %vm471_vm2, %v2725_v21  ;;  %v2757_v21 = vsel %vm2720_vm7, %v2754_v61, %v2756_v14 }
 0x12b   : > { %5194 = vmatprep.mubr.msk.bf16.mxu0 %vm471_vm2, %v2727_v27  ;;  %v2733_v25 = vsel %vm2720_vm7, %v2730_v31, %v2732_v40  ;;  %v1529_v29 = vsel %vm1478_vm3, %v1524_v22, %v1528_v24  ;;  %v6710_v24 = vld [vmem:[%s7232_s3] ss:$0 sm:$0xff] }
 0x130   : > { %5025 = vmatmul.mubr.msk.bf16.gmra.mrb[24].mxu1 %vm471_vm2, %v6471_v53  ;;  %v2735_v53 = vsel %vm2720_vm7, %v2732_v40, %v2734_v4 }
 0x131   : > { %5028 = vmatprep.mubr.msk.bf16.mxu1 %vm471_vm2, %v6484_v52  ;;  %v1255_v52 = vrot.slane %v6078_v12, 1 }
 0x132   : > { %5195 = vmatmul.mubr.msk.bf16.gmra.mrb[4].mxu0 %vm471_vm2, %v2729_v3 }
 0x133   : > { %5198 = vmatprep.mubr.msk.bf16.mxu0 %vm471_vm2, %v2731_v30 }
 0x138   : > { %5029 = vmatmul.mubr.msk.bf16.gmra.mrb[28].mxu1 %vm471_vm2, %v6487_v15  ;;  %v1256_v15 = vsel %vm944_vm6, %v7299_v0, %v1255_v52 }
 0x139   : > { %5032 = vmatprep.mubr.msk.bf16.mxu1 %vm471_vm2, %v6501_v18  ;;  %v7300_v18 = vld [vmem:[#allocation7_spill] sm:$0xff] }
 0x13a   : > { %5199 = vmatmul.mubr.msk.bf16.gmra.mrb[8].mxu0 %vm471_vm2, %v2733_v25  ;;  %v1525_v32 = vsel %vm1478_vm3, %v7300_v18, %v1524_v22 }
 0x13b   : > { %5202 = vmatprep.mubr.msk.bf16.mxu0 %vm471_vm2, %v2735_v53 }
 0x140   : > { %5033 = vmatmul.mubr.msk.bf16.gmra.mrb[32].mxu1 %vm471_vm2, %v1256_v15  ;;  %v5667_v15 = vmov 1983009808  }
 0x141   : > { %5058 = vmatprep.mubr.msk.bf16.mxu1 %vm471_vm2, %v1525_v32  ;;  %v3188_v10 = vunpack.c.l.s4 %v5667_v15  ;;  %v6705_v32 = vld [vmem:[%s7231_s2] ss:$0 sm:$0xff] }
 0x142   : > { %5203 = vmatmul.mubr.msk.bf16.gmra.mrb[12].mxu0 %vm471_vm2, %v2737_v35  ;;  %v3191_v35 = vshrl.u32 %v3190_v17, 7 }
 0x143   : > { %5206 = vmatprep.mubr.msk.bf16.mxu0 %vm471_vm2, %v2739_v57  ;;  %v3189_v37 = vunpack.c.0.s8 %v3188_v10 }
 0x145   : > { %v6715_v33 = vsub.s32 %v3189_v37, %v3191_v35 }
 0x148   : > { %5059 = vmatmul.mubr.msk.bf16.vlgmr.msra.gmra.mrb[20].mxu1 %vm471_vm2, %v1529_v29 }
 0x149   : > { %5062 = vmatprep.mubr.msk.bf16.mxu1 %vm471_vm2, %v1533_v54 }
 0x14a   : > { %5207 = vmatmul.mubr.msk.bf16.gmra.mrb[16].mxu0 %vm471_vm2, %v2741_v9 }
 0x14b   : > { %5210 = vmatprep.mubr.msk.bf16.mxu0 %vm471_vm2, %v2743_v58 }
 0x150   : > { %5063 = vmatmul.mubr.msk.bf16.gmra.mrb[24].mxu1 %vm471_vm2, %v1537_v41 }
 0x151   : > { %5066 = vmatprep.mubr.msk.bf16.mxu1 %vm471_vm2, %v1541_v39 }
 0x152   : > { %5211 = vmatmul.mubr.msk.bf16.gmra.mrb[20].mxu0 %vm471_vm2, %v2745_v63 }
 0x153   : > { %5214 = vmatprep.mubr.msk.bf16.mxu0 %vm471_vm2, %v2747_v45 }
 0x158   : > { %5067 = vmatmul.mubr.msk.bf16.gmra.mrb[28].mxu1 %vm471_vm2, %v1545_v46 }
 0x159   : > { %5070 = vmatprep.mubr.msk.bf16.mxu1 %vm471_vm2, %v1551_v23 }
 0x15a   : > { %5215 = vmatmul.mubr.msk.bf16.gmra.mrb[24].mxu0 %vm471_vm2, %v2749_v20 }
 0x15b   : > { %5218 = vmatprep.mubr.msk.bf16.mxu0 %vm471_vm2, %v2751_v6 }
 0x160   : > { %5071 = vmatmul.mubr.msk.bf16.gmra.mrb[32].mxu1 %vm471_vm2, %v6453_v36 }
 0x162   : > { %5219 = vmatmul.mubr.msk.bf16.gmra.mrb[28].mxu0 %vm471_vm2, %v2753_v43 }
 0x163   : > { %5222 = vmatprep.mubr.msk.bf16.mxu0 %vm471_vm2, %v2755_v44 }
 0x16a   : > { %5223 = vmatmul.mubr.msk.bf16.gmra.mrb[32].mxu0 %vm471_vm2, %v2757_v21 }
 0x1d3   : > { %v5002_v7 = vpop.f32.mrb[0].mxu1 }
 0x1d4   : > { %v1297_v27 = vpop.f32.mrb[1].mxu1 }
 0x1d5   : > { %v5003_v12 = vpop.f32.mrb[2].mxu1 }
 0x1d6   : > { %v1300_v59 = vpop.f32.mrb[3].mxu1 }
 0x1db   : > { %v5006_v31 = vpop.f32.mrb[4].mxu1 }
 0x1dc   : > { %v1313_v3 = vpop.f32.mrb[5].mxu1 }
 0x1dd   : > { %v6674_v30 = vpop.f32.mrb[6].mxu1 }
 0x1de   : > { %v6676_v36 = vpop.f32.mrb[7].mxu1 }
 0x1e3   : > { %v6678_v40 = vpop.f32.mrb[8].mxu1 }
 0x1e4   : > { %v6680_v4 = vpop.f32.mrb[9].mxu1 }
 0x1e5   : > { %v6682_v11 = vpop.f32.mrb[10].mxu1 }
 0x1e6   : > { %v6684_v60 = vpop.f32.mrb[11].mxu1 }
 0x1eb   : > { %v6686_v50 = vpop.f32.mrb[12].mxu1 }
 0x1ec   : > { %v6688_v25 = vpop.f32.mrb[13].mxu1 }
 0x1ed   : > { %v6690_v53 = vpop.f32.mrb[14].mxu1 }
 0x1ee   : > { %v6692_v52 = vpop.f32.mrb[15].mxu1 }
 0x1f3   : > { %v6694_v22 = vpop.f32.mrb[16].mxu1 }
 0x1f4   : > { %v6696_v56 = vpop.f32.mrb[17].mxu1 }
 0x1f5   : > { %v6698_v48 = vpop.f32.mrb[18].mxu1 }
 0x1f6   : > { %v6700_v0 = vpop.f32.mrb[19].mxu1 }
 0x1fd   : > { %v5192_v18 = vpop.f32.mrb[0].mxu0 }
 0x1fe   : > { %v5228_v13 = vadd.f32 %v5192_v18, %v5002_v7  ;;  %v2849_v57 = vpop.f32.mrb[1].mxu0 }
 0x1ff   : > { %v5229_v28 = vadd.f32 %v2849_v57, %v1297_v27  ;;  %v5193_v42 = vpop.f32.mrb[2].mxu0 }
 0x200   : > { %v3037_v34 = vmul.f32 %v5228_v13, %v6705_v32  ;;  %v5230_v29 = vadd.f32 %v5193_v42, %v5003_v12  ;;  %v2852_v1 = vpop.f32.mrb[3].mxu0 }
 0x201   : > { %v3035_v38 = vmul.f32 %v5229_v28, %v6705_v32  ;;  %v5231_v54 = vadd.f32 %v2852_v1, %v1300_v59 }
 0x202   : > { %v3080_v2 = vadd.f32 %v6710_v24, %v3037_v34  ;;  %v3038_v9 = vmul.f32 %v5230_v29, %v6705_v32 }
 0x203   : > { %v3078_v58 = vadd.f32 %v6710_v24, %v3035_v38  ;;  %v3036_v5 = vmul.f32 %v5231_v54, %v6705_v32 }
 0x204   : > { %v3116_v16 = vmax.f32 %v3080_v2, 0.0  ;;  %v3081_v8 = vadd.f32 %v6710_v24, %v3038_v9 }
 0x205   : > { %v3114_v55 = vmax.f32 %v3078_v58, 0.0  ;;  %v3079_v41 = vadd.f32 %v6710_v24, %v3036_v5  ;;  %v5196_v19 = vpop.f32.mrb[4].mxu0 }
 0x206   : > { %v3220_v26 = vcombine.high %v3116_v16, %v3116_v16  ;;  %v3227_v39 = vrot.slane %v3116_v16, %v6715_v33  ;;  %v3117_v63 = vmax.f32 %v3081_v8, 0.0  ;;  %v5232_v45 = vadd.f32 %v5196_v19, %v5006_v31  ;;  %v2865_v62 = vpop.f32.mrb[5].mxu0 }
 0x207   : > { %v3186_v47 = vcombine.high %v3114_v55, %v3114_v55  ;;  %v3193_v51 = vrot.slane %v3114_v55, %v6715_v33  ;;  %v3115_v46 = vmax.f32 %v3079_v41, 0.0  ;;  %v5233_v23 = vadd.f32 %v2865_v62, %v1313_v3  ;;  %v5197_v20 = vpop.f32.mrb[6].mxu0 }
 0x208   : > { %v3234_v6 = vrot.slane %v3220_v26, %v6715_v33  ;;  %v3235_v49 = vcombine.high %v3227_v39, %v3227_v39  ;;  %v3237_v61 = vcombine.high %v3117_v63, %v3117_v63  ;;  %v3244_v43 = vrot.slane %v3117_v63, %v6715_v33  ;;  %v2868_v44 = vpop.f32.mrb[7].mxu0 }
 0x209   : > { %v3200_v14 = vrot.slane %v3186_v47, %v6715_v33  ;;  %v3201_v21 = vcombine.high %v3193_v51, %v3193_v51  ;;  %v3203_v7 = vcombine.high %v3115_v46, %v3115_v46  ;;  %v3210_v27 = vrot.slane %v3115_v46, %v6715_v33 }
 0x20a   : > { %v3824_v12 = vcombine.low %v3235_v49, %v3234_v6  ;;  %v3236_v59 = vcombine.high %v3234_v6, %v3234_v6  ;;  %v3251_v31 = vrot.slane %v3237_v61, %v6715_v33  ;;  %v3252_v3 = vcombine.high %v3244_v43, %v3244_v43 }
 0x20b   : > { %v3202_v15 = vcombine.high %v3200_v14, %v3200_v14  ;;  %v3790_v10 = vcombine.low %v3193_v51, %v3201_v21  ;;  %v3217_v17 = vrot.slane %v3203_v7, %v6715_v33  ;;  %v3218_v18 = vcombine.high %v3210_v27, %v3210_v27 }
 0x20c   : > { %v3832_v13 = vrot.slane %v3824_v12, %v6715_v33  ;;  %v3825_v37 = vcombine.low %v3236_v59, %v3244_v43  ;;  %v6734_v35 = vcombine.low %v3252_v3, %v3251_v31  ;;  %v3041_v57 = vmul.f32 %v5232_v45, %v6705_v32 }
 0x20d   : > { %v3791_v28 = vcombine.low %v3200_v14, %v3202_v15  ;;  %v3798_v42 = vrot.slane %v3790_v10, %v6715_v33  ;;  %v3219_v34 = vcombine.high %v3217_v17, %v3217_v17  ;;  %v3807_v29 = vcombine.low %v3210_v27, %v3218_v18  ;;  %v5200_v1 = vpop.f32.mrb[8].mxu0 }
 0x20e   : > { %v3839_v38 = vrot.slane %v3825_v37, %v6715_v33  ;;  %v3849_v54 = vrot.slane %v6734_v35, %v6715_v33  ;;  %v3084_v2 = vadd.f32 %v6710_v24, %v3041_v57  ;;  %v3039_v9 = vmul.f32 %v5233_v23, %v6705_v32  ;;  %v2881_v58 = vpop.f32.mrb[9].mxu0 }
 0x20f   : > { %v3805_v5 = vrot.slane %v3791_v28, %v6715_v33  ;;  %v3808_v16 = vcombine.low %v3217_v17, %v3219_v34  ;;  %v3815_v8 = vrot.slane %v3807_v29, %v6715_v33  ;;  %v3253_v55 = vcombine.high %v3251_v31, %v3251_v31  ;;  %v5201_v41 = vpop.f32.mrb[10].mxu0 }
 0x210   : > { %v3840_v19 = vcombine.low %v3832_v13, %v3839_v38  ;;  %v3120_v26 = vmax.f32 %v3084_v2, 0.0  ;;  %v3082_v39 = vadd.f32 %v6710_v24, %v3039_v9  ;;  %v5234_v63 = vadd.f32 %v5197_v20, %v6674_v30  ;;  %v6747_v45 = vpop.f32.mrb[11].mxu0 }
 0x211   : > { %v3806_v62 = vcombine.low %v3798_v42, %v3805_v5  ;;  %v3822_v47 = vrot.slane %v3808_v16, %v6715_v33  ;;  %v5235_v51 = vadd.f32 %v2868_v44, %v6676_v36  ;;  %v5236_v46 = vadd.f32 %v5200_v1, %v6678_v40 }
 0x212   : > { %4369 = vst.msk [vmem:[%s6752_s22 + $0x10] sm:$0xff] %vm4366_vm8, %v3840_v19  ;;  %v3287_v23 = vcombine.high %v3120_v26, %v3120_v26  ;;  %v3294_v6 = vrot.slane %v3120_v26, %v6715_v33  ;;  %v3118_v30 = vmax.f32 %v3082_v39, 0.0  ;;  %v3042_v20 = vmul.f32 %v5234_v63, %v6705_v32 }
 0x213   : > { %4367 = vst.msk [vmem:[%s6752_s22] sm:$0xff] %vm4366_vm8, %v3806_v62  ;;  %v3823_v49 = vcombine.low %v3815_v8, %v3822_v47  ;;  %v3040_v36 = vmul.f32 %v5235_v51, %v6705_v32  ;;  %v3045_v40 = vmul.f32 %v5236_v46, %v6705_v32  ;;  %v5237_v61 = vadd.f32 %v2881_v58, %v6680_v4 }
 0x214   : > { %v3301_v43 = vrot.slane %v3287_v23, %v6715_v33  ;;  %v3302_v44 = vcombine.high %v3294_v6, %v3294_v6  ;;  %v3254_v14 = vcombine.high %v3118_v30, %v3118_v30  ;;  %v3261_v21 = vrot.slane %v3118_v30, %v6715_v33 }
 0x215   : > { %4368 = vst.msk [vmem:[%s6752_s22 + $0x8] sm:$0xff] %vm4366_vm8, %v3823_v49  ;;  %v3085_v7 = vadd.f32 %v6710_v24, %v3042_v20  ;;  %v3083_v27 = vadd.f32 %v6710_v24, %v3040_v36  ;;  %v3088_v12 = vadd.f32 %v6710_v24, %v3045_v40  ;;  %v3043_v59 = vmul.f32 %v5237_v61, %v6705_v32  ;;  %v6771_v31 = vpop.f32.mrb[12].mxu0 }
 0x216   : > { %v3303_v3 = vcombine.high %v3301_v43, %v3301_v43  ;;  %v6773_v4 = vcombine.low %v3294_v6, %v3302_v44  ;;  %v3268_v15 = vrot.slane %v3254_v14, %v6715_v33  ;;  %v3842_v10 = vcombine.low %v3253_v55, %v3261_v21  ;;  %v6776_v17 = vpop.f32.mrb[13].mxu0 }
 0x217   : > { %v3121_v18 = vmax.f32 %v3085_v7, 0.0  ;;  %v3119_v13 = vmax.f32 %v3083_v27, 0.0  ;;  %v3124_v37 = vmax.f32 %v3088_v12, 0.0  ;;  %v3086_v35 = vadd.f32 %v6710_v24, %v3043_v59  ;;  %v6779_v57 = vpop.f32.mrb[14].mxu0 }
 0x218   : > { %v3890_v28 = vrot.slane %v6773_v4, %v6715_v33  ;;  %v3269_v42 = vcombine.high %v3268_v15, %v3268_v15  ;;  %v3856_v34 = vrot.slane %v3842_v10, %v6715_v33  ;;  %v5238_v29 = vadd.f32 %v5201_v41, %v6682_v11  ;;  %v6785_v1 = vpop.f32.mrb[15].mxu0 }
 0x219   : > { %v3304_v38 = vcombine.high %v3121_v18, %v3121_v18  ;;  %v3311_v2 = vrot.slane %v3121_v18, %v6715_v33  ;;  %v3270_v9 = vcombine.high %v3119_v13, %v3119_v13  ;;  %v3277_v58 = vrot.slane %v3119_v13, %v6715_v33 }
 0x21a   : > { %v3857_v5 = vcombine.low %v3849_v54, %v3856_v34  ;;  %v3858_v16 = vcombine.low %v3268_v15, %v3269_v42  ;;  %v3354_v8 = vcombine.high %v3124_v37, %v3124_v37  ;;  %v3361_v55 = vrot.slane %v3124_v37, %v6715_v33 }
 0x21b   : > { %v3318_v19 = vrot.slane %v3304_v38, %v6715_v33  ;;  %v3319_v26 = vcombine.high %v3311_v2, %v3311_v2  ;;  %v3892_v39 = vcombine.low %v3303_v3, %v3311_v2  ;;  %v3284_v11 = vrot.slane %v3270_v9, %v6715_v33  ;;  %v6792_v41 = vpop.f32.mrb[20].mxu1 }
 0x21c   : > { %v3866_v63 = vrot.slane %v3858_v16, %v6715_v33  ;;  %4370 = vst.msk [vmem:[%s6752_s22 + $0x18] sm:$0xff] %vm4366_vm8, %v3857_v5  ;;  %v3285_v62 = vcombine.high %v3277_v58, %v3277_v58  ;;  %v3368_v47 = vrot.slane %v3354_v8, %v6715_v33  ;;  %v3369_v54 = vcombine.high %v3361_v55, %v3361_v55  ;;  %v6798_v51 = vpop.f32.mrb[21].mxu1 }
 0x21d   : > { %v3893_v46 = vcombine.low %v3319_v26, %v3318_v19  ;;  %v3900_v23 = vrot.slane %v3892_v39, %v6715_v33  ;;  %v3286_v6 = vcombine.high %v3284_v11, %v3284_v11  ;;  %v3122_v30 = vmax.f32 %v3086_v35, 0.0  ;;  %v6801_v20 = vpop.f32.mrb[16].mxu0  ;;  %v6803_v49 = vpop.f32.mrb[22].mxu1 }
 0x21e   : > { %v3859_v36 = vcombine.low %v3277_v58, %v3285_v62  ;;  %v3370_v40 = vcombine.high %v3368_v47, %v3368_v47  ;;  %v3943_v61 = vcombine.low %v3361_v55, %v3369_v54  ;;  %v3320_v43 = vcombine.high %v3318_v19, %v3318_v19  ;;  %v6805_v44 = vpop.f32.mrb[17].mxu0  ;;  %v6807_v14 = vpop.f32.mrb[23].mxu1 }
 0x21f   : > { %v3907_v21 = vrot.slane %v3893_v46, %v6715_v33  ;;  %v3875_v7 = vcombine.low %v3284_v11, %v3286_v6  ;;  %v3321_v27 = vcombine.high %v3122_v30, %v3122_v30  ;;  %v3328_v12 = vrot.slane %v3122_v30, %v6715_v33  ;;  %v6811_v59 = vpop.f32.mrb[18].mxu0 }
 0x220   : > { %v3873_v3 = vrot.slane %v3859_v36, %v6715_v33  ;;  %v3944_v4 = vcombine.low %v3368_v47, %v3370_v40  ;;  %v3951_v15 = vrot.slane %v3943_v61, %v6715_v33  ;;  %v3046_v10 = vmul.f32 %v5238_v29, %v6705_v32  ;;  %v6816_v18 = vpop.f32.mrb[19].mxu0 }
 0x221   : > { %v3908_v13 = vcombine.low %v3900_v23, %v3907_v21  ;;  %v3883_v37 = vrot.slane %v3875_v7, %v6715_v33  ;;  %v3335_v35 = vrot.slane %v3321_v27, %v6715_v33  ;;  %v3336_v42 = vcombine.high %v3328_v12, %v3328_v12 }
 0x222   : > { %v3874_v34 = vcombine.low %v3866_v63, %v3873_v3  ;;  %v3958_v38 = vrot.slane %v3944_v4, %v6715_v33  ;;  %v3909_v2 = vcombine.low %v3320_v43, %v3328_v12  ;;  %v3089_v9 = vadd.f32 %v6710_v24, %v3046_v10 }
 0x223   : > { %4373 = vst.msk [vmem:[%s6752_s22 + $0x30] sm:$0xff] %vm4366_vm8, %v3908_v13  ;;  %v3891_v58 = vcombine.low %v3883_v37, %v3890_v28  ;;  %v3910_v29 = vcombine.low %v3336_v42, %v3335_v35  ;;  %v5239_v5 = vadd.f32 %v6747_v45, %v6684_v60  ;;  %v5240_v16 = vadd.f32 %v6771_v31, %v6686_v50  ;;  %v6828_v8 = vpop.f32.mrb[24].mxu1 }
 0x224   : > { %4371 = vst.msk [vmem:[%s6752_s22 + $0x20] sm:$0xff] %vm4366_vm8, %v3874_v34  ;;  %v3959_v55 = vcombine.low %v3951_v15, %v3958_v38  ;;  %v3917_v19 = vrot.slane %v3909_v2, %v6715_v33  ;;  %v3125_v26 = vmax.f32 %v3089_v9, 0.0  ;;  %v5241_v39 = vadd.f32 %v6776_v17, %v6688_v25  ;;  %v6835_v28 = vpop.f32.mrb[25].mxu1 }
 0x225   : > { %4372 = vst.msk [vmem:[%s6752_s22 + $0x28] sm:$0xff] %vm4366_vm8, %v3891_v58  ;;  %v3924_v60 = vrot.slane %v3910_v29, %v6715_v33  ;;  %v3044_v45 = vmul.f32 %v5239_v5, %v6705_v32  ;;  %v3049_v50 = vmul.f32 %v5240_v16, %v6705_v32  ;;  %v5242_v31 = vadd.f32 %v6779_v57, %v6690_v53  ;;  %v6844_v11 = vpop.f32.mrb[20].mxu0  ;;  %v6846_v63 = vpop.f32.mrb[26].mxu1 }
 0x226   : > { %4376 = vst.msk [vmem:[%s6752_s22 + $0x48] sm:$0xff] %vm4366_vm8, %v3959_v55  ;;  %v3371_v25 = vcombine.high %v3125_v26, %v3125_v26  ;;  %v3378_v17 = vrot.slane %v3125_v26, %v6715_v33  ;;  %v3047_v62 = vmul.f32 %v5241_v39, %v6705_v32  ;;  %v5243_v47 = vadd.f32 %v6785_v1, %v6692_v52  ;;  %v6854_v54 = vpop.f32.mrb[21].mxu0  ;;  %v6856_v46 = vpop.f32.mrb[27].mxu1 }
 0x227   : > { %v3925_v53 = vcombine.low %v3917_v19, %v3924_v60  ;;  %v3087_v57 = vadd.f32 %v6710_v24, %v3044_v45  ;;  %v3092_v23 = vadd.f32 %v6710_v24, %v3049_v50  ;;  %v3050_v6 = vmul.f32 %v5242_v31, %v6705_v32  ;;  %v6861_v30 = vpop.f32.mrb[22].mxu0 }
 0x228   : > { %v3385_v36 = vrot.slane %v3371_v25, %v6715_v33  ;;  %v3386_v40 = vcombine.high %v3378_v17, %v3378_v17  ;;  %v3090_v61 = vadd.f32 %v6710_v24, %v3047_v62  ;;  %v3048_v52 = vmul.f32 %v5243_v47, %v6705_v32  ;;  %v6866_v1 = vpop.f32.mrb[23].mxu0 }
 0x229   : > { %4374 = vst.msk [vmem:[%s6752_s22 + $0x38] sm:$0xff] %vm4366_vm8, %v3925_v53  ;;  %v3123_v43 = vmax.f32 %v3087_v57, 0.0  ;;  %v3128_v21 = vmax.f32 %v3092_v23, 0.0  ;;  %v3093_v7 = vadd.f32 %v6710_v24, %v3050_v6  ;;  %v5244_v27 = vadd.f32 %v6801_v20, %v6694_v22 }
 0x22a   : > { %v3960_v12 = vcombine.low %v3386_v40, %v3385_v36  ;;  %v3126_v3 = vmax.f32 %v3090_v61, 0.0  ;;  %v3387_v4 = vcombine.high %v3385_v36, %v3385_v36  ;;  %v3091_v15 = vadd.f32 %v6710_v24, %v3048_v52 }
 0x22b   : > { %v3337_v10 = vcombine.high %v3123_v43, %v3123_v43  ;;  %v3344_v13 = vrot.slane %v3123_v43, %v6715_v33  ;;  %v3421_v37 = vcombine.high %v3128_v21, %v3128_v21  ;;  %v3428_v35 = vrot.slane %v3128_v21, %v6715_v33  ;;  %v6876_v42 = vpop.f32.mrb[28].mxu1 }
 0x22c   : > { %v3968_v34 = vrot.slane %v3960_v12, %v6715_v33  ;;  %v3388_v38 = vcombine.high %v3126_v3, %v3126_v3  ;;  %v3395_v2 = vrot.slane %v3126_v3, %v6715_v33  ;;  %v3129_v9 = vmax.f32 %v3093_v7, 0.0  ;;  %v6880_v22 = vpop.f32.mrb[29].mxu1 }
 0x22d   : > { %v3351_v20 = vrot.slane %v3337_v10, %v6715_v33  ;;  %v3352_v58 = vcombine.high %v3344_v13, %v3344_v13  ;;  %v3435_v29 = vrot.slane %v3421_v37, %v6715_v33  ;;  %v3436_v5 = vcombine.high %v3428_v35, %v3428_v35  ;;  %v6884_v16 = vpop.f32.mrb[24].mxu0  ;;  %v6886_v55 = vpop.f32.mrb[30].mxu1 }
 0x22e   : > { %v3402_v19 = vrot.slane %v3388_v38, %v6715_v33  ;;  %v3403_v26 = vcombine.high %v3395_v2, %v3395_v2  ;;  %v3961_v39 = vcombine.low %v3387_v4, %v3395_v2  ;;  %v3438_v60 = vcombine.high %v3129_v9, %v3129_v9  ;;  %v6889_v45 = vpop.f32.mrb[25].mxu0  ;;  %v6891_v50 = vpop.f32.mrb[31].mxu1 }
 0x22f   : > { %v3353_v31 = vcombine.high %v3351_v20, %v3351_v20  ;;  %v3926_v25 = vcombine.low %v3344_v13, %v3352_v58  ;;  %v3437_v17 = vcombine.high %v3435_v29, %v3435_v29  ;;  %v6893_v62 = vcombine.low %v3428_v35, %v3436_v5  ;;  %v6895_v47 = vpop.f32.mrb[26].mxu0 }
 0x230   : > { %v3975_v53 = vrot.slane %v3961_v39, %v6715_v33  ;;  %v3977_v57 = vcombine.low %v3403_v26, %v3402_v19  ;;  %v3445_v23 = vrot.slane %v3129_v9, %v6715_v33  ;;  %v6900_v6 = vrot.slane %v3438_v60, %v6715_v33  ;;  %v6902_v36 = vpop.f32.mrb[27].mxu0 }
 0x231   : > { %v3927_v40 = vcombine.low %v3351_v20, %v3353_v31  ;;  %v3934_v61 = vrot.slane %v3926_v25, %v6715_v33  ;;  %v4009_v52 = vrot.slane %v6893_v62, %v6715_v33  ;;  %v4011_v43 = vcombine.low %v3435_v29, %v3437_v17 }
 0x232   : > { %v3976_v21 = vcombine.low %v3968_v34, %v3975_v53  ;;  %v3985_v7 = vrot.slane %v3977_v57, %v6715_v33  ;;  %v3453_v12 = vcombine.high %v3445_v23, %v3445_v23  ;;  %v3454_v3 = vcombine.high %v6900_v6, %v6900_v6 }
 0x233   : > { %v3941_v4 = vrot.slane %v3927_v40, %v6715_v33  ;;  %v4019_v10 = vrot.slane %v4011_v43, %v6715_v33  ;;  %v3127_v13 = vmax.f32 %v3091_v15, 0.0  ;;  %v3404_v37 = vcombine.high %v3402_v19, %v3402_v19  ;;  %v6912_v35 = vpop.f32.mrb[32].mxu1 }
 0x234   : > { %4377 = vst.msk [vmem:[%s6752_s22 + $0x50] sm:$0xff] %vm4366_vm8, %v3976_v21  ;;  %v4012_v38 = vcombine.low %v3445_v23, %v3453_v12  ;;  %v3053_v2 = vmul.f32 %v5244_v27, %v6705_v32  ;;  %v5245_v34 = vadd.f32 %v6805_v44, %v6696_v56  ;;  %v5246_v9 = vadd.f32 %v6811_v59, %v6698_v48  ;;  %v6921_v20 = vpop.f32.mrb[33].mxu1 }
 0x235   : > { %v3942_v58 = vcombine.low %v3934_v61, %v3941_v4  ;;  %v3405_v29 = vcombine.high %v3127_v13, %v3127_v13  ;;  %v3412_v15 = vrot.slane %v3127_v13, %v6715_v33  ;;  %v5247_v5 = vadd.f32 %v6816_v18, %v6700_v0  ;;  %v6926_v19 = vpop.f32.mrb[28].mxu0  ;;  %v6928_v26 = vpop.f32.mrb[34].mxu1 }
 0x236   : > { %v4026_v27 = vrot.slane %v4012_v38, %v6715_v33  ;;  %v3096_v56 = vadd.f32 %v6710_v24, %v3053_v2  ;;  %v3051_v44 = vmul.f32 %v5245_v34, %v6705_v32  ;;  %v3054_v48 = vmul.f32 %v5246_v9, %v6705_v32  ;;  %v6934_v59 = vpop.f32.mrb[29].mxu0  ;;  %v6936_v39 = vpop.f32.mrb[35].mxu1 }
 0x237   : > { %4375 = vst.msk [vmem:[%s6752_s22 + $0x40] sm:$0xff] %vm4366_vm8, %v3942_v58  ;;  %v3419_v0 = vrot.slane %v3405_v29, %v6715_v33  ;;  %v3978_v18 = vcombine.low %v3404_v37, %v3412_v15  ;;  %v3052_v60 = vmul.f32 %v5247_v5, %v6705_v32  ;;  %v5248_v31 = vadd.f32 %v6844_v11, %v6792_v41  ;;  %v6944_v25 = vpop.f32.mrb[30].mxu0 }
 0x238   : > { %v4027_v17 = vcombine.low %v4019_v10, %v4026_v27  ;;  %v3132_v53 = vmax.f32 %v3096_v56, 0.0  ;;  %v3094_v57 = vadd.f32 %v6710_v24, %v3051_v44  ;;  %v3097_v23 = vadd.f32 %v6710_v24, %v3054_v48  ;;  %v6948_v40 = vpop.f32.mrb[31].mxu0 }
 0x239   : > { %v3420_v61 = vcombine.high %v3419_v0, %v3419_v0  ;;  %v3992_v43 = vrot.slane %v3978_v18, %v6715_v33  ;;  %v3095_v21 = vadd.f32 %v6710_v24, %v3052_v60  ;;  %v3057_v12 = vmul.f32 %v5248_v31, %v6705_v32 }
 0x23a   : > { %4380 = vst.msk [vmem:[%s6752_s22 + $0x68] sm:$0xff] %vm4366_vm8, %v4027_v17  ;;  %v3488_v41 = vcombine.high %v3132_v53, %v3132_v53  ;;  %v3495_v11 = vrot.slane %v3132_v53, %v6715_v33  ;;  %v3130_v4 = vmax.f32 %v3094_v57, 0.0  ;;  %v3133_v10 = vmax.f32 %v3097_v23, 0.0 }
 0x23b   : > { %v3993_v13 = vcombine.low %v3985_v7, %v3992_v43  ;;  %v3994_v37 = vcombine.low %v3419_v0, %v3420_v61  ;;  %v3131_v38 = vmax.f32 %v3095_v21, 0.0  ;;  %v3100_v2 = vadd.f32 %v6710_v24, %v3057_v12 }
 0x23c   : > { %v3502_v34 = vrot.slane %v3488_v41, %v6715_v33  ;;  %v3503_v9 = vcombine.high %v3495_v11, %v3495_v11  ;;  %v3455_v58 = vcombine.high %v3130_v4, %v3130_v4  ;;  %v3462_v29 = vrot.slane %v3130_v4, %v6715_v33 }
 0x23d   : > { %v4002_v15 = vrot.slane %v3994_v37, %v6715_v33  ;;  %4378 = vst.msk [vmem:[%s6752_s22 + $0x58] sm:$0xff] %vm4366_vm8, %v3993_v13  ;;  %v3505_v5 = vcombine.high %v3133_v10, %v3133_v10  ;;  %v3512_v27 = vrot.slane %v3133_v10, %v6715_v33  ;;  %v3472_v56 = vcombine.high %v3131_v38, %v3131_v38  ;;  %v6963_v44 = vpop.f32.mrb[32].mxu0 }
 0x23e   : > { %v3504_v7 = vcombine.high %v3502_v34, %v3502_v34  ;;  %v4062_v48 = vcombine.low %v3495_v11, %v3503_v9  ;;  %v3469_v0 = vrot.slane %v3455_v58, %v6715_v33  ;;  %v3470_v18 = vcombine.high %v3462_v29, %v3462_v29  ;;  %v6966_v60 = vpop.f32.mrb[33].mxu0 }
 0x23f   : > { %v4010_v31 = vcombine.low %v4002_v15, %v4009_v52  ;;  %v4028_v17 = vcombine.low %v3454_v3, %v3462_v29  ;;  %v3519_v53 = vrot.slane %v3505_v5, %v6715_v33  ;;  %v3520_v57 = vcombine.high %v3512_v27, %v3512_v27  ;;  %v6975_v23 = vpop.f32.mrb[34].mxu0 }
 0x240   : > { %v4063_v61 = vcombine.low %v3502_v34, %v3504_v7  ;;  %v4070_v43 = vrot.slane %v4062_v48, %v6715_v33  ;;  %v4029_v21 = vcombine.low %v3470_v18, %v3469_v0  ;;  %v3471_v12 = vcombine.high %v3469_v0, %v3469_v0  ;;  %v6978_v41 = vpop.f32.mrb[35].mxu0 }
 0x241   : > { %4379 = vst.msk [vmem:[%s6752_s22 + $0x60] sm:$0xff] %vm4366_vm8, %v4010_v31  ;;  %v4036_v62 = vrot.slane %v4028_v17, %v6715_v33  ;;  %v3521_v52 = vcombine.high %v3519_v53, %v3519_v53  ;;  %v4079_v11 = vcombine.low %v3512_v27, %v3520_v57  ;;  %v3479_v6 = vrot.slane %v3131_v38, %v6715_v33 }
 0x242   : > { %v4077_v3 = vrot.slane %v4063_v61, %v6715_v33  ;;  %v4043_v4 = vrot.slane %v4029_v21, %v6715_v33  ;;  %v3486_v10 = vrot.slane %v3472_v56, %v6715_v33  ;;  %v6987_v13 = vmax.f32 %v3100_v2, 0.0 }
 0x243   : > { %v4080_v37 = vcombine.low %v3519_v53, %v3521_v52  ;;  %v4087_v34 = vrot.slane %v4079_v11, %v6715_v33  ;;  %v3487_v9 = vcombine.high %v3479_v6, %v3479_v6  ;;  %v4045_v58 = vcombine.low %v3471_v12, %v3479_v6 }
 0x244   : > { %v4078_v29 = vcombine.low %v4070_v43, %v4077_v3  ;;  %v4044_v15 = vcombine.low %v4036_v62, %v4043_v4  ;;  %v3556_v38 = vcombine.high %v6987_v13, %v6987_v13  ;;  %v3563_v5 = vrot.slane %v6987_v13, %v6715_v33 }
 0x245   : > { %v4094_v27 = vrot.slane %v4080_v37, %v6715_v33  ;;  %v4046_v7 = vcombine.low %v3487_v9, %v3486_v10  ;;  %v4053_v56 = vrot.slane %v4045_v58, %v6715_v33  ;;  %v5249_v2 = vadd.f32 %v6854_v54, %v6798_v51 }
 0x246   : > { %4383 = vst.msk [vmem:[%s6752_s22 + $0x80] sm:$0xff] %vm4366_vm8, %v4078_v29  ;;  %4381 = vst.msk [vmem:[%s6752_s22 + $0x70] sm:$0xff] %vm4366_vm8, %v4044_v15  ;;  %v3570_v48 = vrot.slane %v3556_v38, %v6715_v33  ;;  %v5250_v0 = vadd.f32 %v6861_v30, %v6803_v49  ;;  %v5251_v18 = vadd.f32 %v6866_v1, %v6807_v14 }
 0x247   : > { %v5252_v31 = vadd.f32 %v6884_v16, %v6828_v8  ;;  %v4095_v17 = vcombine.low %v4087_v34, %v4094_v27  ;;  %v4060_v53 = vrot.slane %v4046_v7, %v6715_v33  ;;  %v3055_v51 = vmul.f32 %v5249_v2, %v6705_v32 }
 0x248   : > { %v5253_v54 = vadd.f32 %v6889_v45, %v6835_v28  ;;  %v3571_v57 = vcombine.high %v3570_v48, %v3570_v48  ;;  %v3058_v61 = vmul.f32 %v5250_v0, %v6705_v32  ;;  %v3056_v49 = vmul.f32 %v5251_v18, %v6705_v32 }
 0x249   : > { %v3061_v30 = vmul.f32 %v5252_v31, %v6705_v32  ;;  %4384 = vst.msk [vmem:[%s6752_s22 + $0x88] sm:$0xff] %vm4366_vm8, %v4095_v17  ;;  %v4061_v14 = vcombine.low %v4053_v56, %v4060_v53  ;;  %v3098_v8 = vadd.f32 %v6710_v24, %v3055_v51  ;;  %v5254_v16 = vadd.f32 %v6895_v47, %v6846_v63 }
 0x24a   : > { %v3059_v1 = vmul.f32 %v5253_v54, %v6705_v32  ;;  %v4130_v43 = vcombine.low %v3570_v48, %v3571_v57  ;;  %v3101_v28 = vadd.f32 %v6710_v24, %v3058_v61  ;;  %v3099_v45 = vadd.f32 %v6710_v24, %v3056_v49 }
 0x24b   : > { %v3104_v21 = vadd.f32 %v6710_v24, %v3061_v30  ;;  %4382 = vst.msk [vmem:[%s6752_s22 + $0x78] sm:$0xff] %vm4366_vm8, %v4061_v14  ;;  %v3134_v12 = vmax.f32 %v3098_v8, 0.0  ;;  %v3062_v52 = vmul.f32 %v5254_v16, %v6705_v32  ;;  %v5255_v11 = vadd.f32 %v6902_v36, %v6856_v46 }
 0x24c   : > { %v3102_v62 = vadd.f32 %v6710_v24, %v3059_v1  ;;  %v4138_v6 = vrot.slane %v4130_v43, %v6715_v33  ;;  %v3137_v63 = vmax.f32 %v3101_v28, 0.0  ;;  %v3135_v47 = vmax.f32 %v3099_v45, 0.0 }
 0x24d   : > { %v3140_v3 = vmax.f32 %v3104_v21, 0.0  ;;  %v3522_v4 = vcombine.high %v3134_v12, %v3134_v12  ;;  %v3529_v10 = vrot.slane %v3134_v12, %v6715_v33  ;;  %v3105_v34 = vadd.f32 %v6710_v24, %v3062_v52 }
 0x24e   : > { %v3138_v37 = vmax.f32 %v3102_v62, 0.0  ;;  %v3572_v9 = vcombine.high %v3137_v63, %v3137_v63  ;;  %v3579_v58 = vrot.slane %v3137_v63, %v6715_v33  ;;  %v3539_v29 = vcombine.high %v3135_v47, %v3135_v47 }
 0x24f   : > { %v3546_v15 = vrot.slane %v3135_v47, %v6715_v33  ;;  %v3536_v38 = vrot.slane %v3522_v4, %v6715_v33  ;;  %v3537_v46 = vcombine.high %v3529_v10, %v3529_v10  ;;  %v3623_v36 = vcombine.high %v3140_v3, %v3140_v3 }
 0x250   : > { %v7038_v27 = vrot.slane %v3140_v3, %v6715_v33  ;;  %v3586_v7 = vrot.slane %v3572_v9, %v6715_v33  ;;  %v3587_v56 = vcombine.high %v3579_v58, %v3579_v58  ;;  %v3553_v2 = vrot.slane %v3539_v29, %v6715_v33 }
 0x251   : > { %v3554_v48 = vcombine.high %v3546_v15, %v3546_v15  ;;  %v4096_v0 = vcombine.low %v3537_v46, %v3536_v38  ;;  %v3538_v18 = vcombine.high %v3536_v38, %v3536_v38  ;;  %v3637_v31 = vrot.slane %v3623_v36, %v6715_v33 }
 0x252   : > { %v3638_v17 = vcombine.high %v7038_v27, %v7038_v27  ;;  %v3588_v53 = vcombine.high %v3586_v7, %v3586_v7  ;;  %v4131_v51 = vcombine.low %v3579_v58, %v3587_v56  ;;  %v3555_v54 = vcombine.high %v3553_v2, %v3553_v2 }
 0x253   : > { %v4113_v57 = vcombine.low %v3554_v48, %v3553_v2  ;;  %v4104_v61 = vrot.slane %v4096_v0, %v6715_v33  ;;  %v4097_v49 = vcombine.low %v3538_v18, %v3546_v15  ;;  %v3589_v30 = vcombine.high %v3138_v37, %v3138_v37 }
 0x254   : > { %v4145_v14 = vrot.slane %v4131_v51, %v6715_v33  ;;  %v4147_v8 = vcombine.low %v3586_v7, %v3588_v53  ;;  %v4114_v1 = vcombine.low %v3555_v54, %v3563_v5  ;;  %v7050_v16 = vcombine.low %v3638_v17, %v3637_v31 }
 0x255   : > { %v4111_v43 = vrot.slane %v4097_v49, %v6715_v33  ;;  %v4121_v28 = vrot.slane %v4113_v57, %v6715_v33  ;;  %v3596_v45 = vrot.slane %v3138_v37, %v6715_v33  ;;  %v3603_v21 = vrot.slane %v3589_v30, %v6715_v33 }
 0x256   : > { %v4146_v12 = vcombine.low %v4138_v6, %v4145_v14  ;;  %v4155_v62 = vrot.slane %v4147_v8, %v6715_v33  ;;  %v4128_v52 = vrot.slane %v4114_v1, %v6715_v33  ;;  %v3141_v63 = vmax.f32 %v3105_v34, 0.0 }
 0x257   : > { %v4112_v13 = vcombine.low %v4104_v61, %v4111_v43  ;;  %v3604_v5 = vcombine.high %v3596_v45, %v3596_v45  ;;  %v3605_v47 = vcombine.high %v3603_v21, %v3603_v21  ;;  %v3060_v3 = vmul.f32 %v5255_v11, %v6705_v32 }
 0x258   : > { %4387 = vst.msk [vmem:[%s6752_s22 + $0xa0] sm:$0xff] %vm4366_vm8, %v4146_v12  ;;  %v4129_v4 = vcombine.low %v4121_v28, %v4128_v52  ;;  %v3639_v10 = vcombine.high %v3141_v63, %v3141_v63  ;;  %v3646_v37 = vrot.slane %v3141_v63, %v6715_v33  ;;  %v5256_v6 = vadd.f32 %v6926_v19, %v6876_v42 }
 0x259   : > { %4385 = vst.msk [vmem:[%s6752_s22 + $0x90] sm:$0xff] %vm4366_vm8, %v4112_v13  ;;  %v4148_v9 = vcombine.low %v3596_v45, %v3604_v5  ;;  %v3103_v58 = vadd.f32 %v6710_v24, %v3060_v3  ;;  %v5257_v34 = vadd.f32 %v6934_v59, %v6880_v22  ;;  %v5258_v11 = vadd.f32 %v6944_v25, %v6886_v55 }
 0x25a   : > { %4386 = vst.msk [vmem:[%s6752_s22 + $0x98] sm:$0xff] %vm4366_vm8, %v4129_v4  ;;  %v3653_v29 = vrot.slane %v3639_v10, %v6715_v33  ;;  %v3654_v15 = vcombine.high %v3646_v37, %v3646_v37  ;;  %v3065_v38 = vmul.f32 %v5256_v6, %v6705_v32  ;;  %v5259_v42 = vadd.f32 %v6948_v40, %v6891_v50 }
 0x25b   : > { %v4162_v19 = vrot.slane %v4148_v9, %v6715_v33  ;;  %v3139_v46 = vmax.f32 %v3103_v58, 0.0  ;;  %v3063_v36 = vmul.f32 %v5257_v34, %v6705_v32  ;;  %v3066_v22 = vmul.f32 %v5258_v11, %v6705_v32 }
 0x25c   : > { %v3655_v59 = vcombine.high %v3653_v29, %v3653_v29  ;;  %v4198_v55 = vcombine.low %v3646_v37, %v3654_v15  ;;  %v3108_v25 = vadd.f32 %v6710_v24, %v3065_v38  ;;  %v3064_v7 = vmul.f32 %v5259_v42, %v6705_v32 }
 0x25d   : > { %v4163_v56 = vcombine.low %v4155_v62, %v4162_v19  ;;  %v3606_v2 = vcombine.high %v3139_v46, %v3139_v46  ;;  %v3613_v48 = vrot.slane %v3139_v46, %v6715_v33  ;;  %v3106_v50 = vadd.f32 %v6710_v24, %v3063_v36 }
 0x25e   : > { %v4199_v40 = vcombine.low %v3653_v29, %v3655_v59  ;;  %v4206_v0 = vrot.slane %v4198_v55, %v6715_v33  ;;  %v3144_v18 = vmax.f32 %v3108_v25, 0.0  ;;  %v3109_v31 = vadd.f32 %v6710_v24, %v3066_v22 }
 0x25f   : > { %4388 = vst.msk [vmem:[%s6752_s22 + $0xa8] sm:$0xff] %vm4366_vm8, %v4163_v56  ;;  %v3620_v17 = vrot.slane %v3606_v2, %v6715_v33  ;;  %v3621_v53 = vcombine.high %v3613_v48, %v3613_v48  ;;  %v4164_v51 = vcombine.low %v3605_v47, %v3613_v48  ;;  %v3142_v54 = vmax.f32 %v3106_v50, 0.0 }
 0x260   : > { %v4213_v57 = vrot.slane %v4199_v40, %v6715_v33  ;;  %v3690_v61 = vcombine.high %v3144_v18, %v3144_v18  ;;  %v7091_v49 = vrot.slane %v3144_v18, %v6715_v33  ;;  %v3145_v30 = vmax.f32 %v3109_v31, 0.0 }
 0x261   : > { %v3622_v14 = vcombine.high %v3620_v17, %v3620_v17  ;;  %v4165_v8 = vcombine.low %v3621_v53, %v3620_v17  ;;  %v4172_v1 = vrot.slane %v4164_v51, %v6715_v33  ;;  %v3656_v43 = vcombine.high %v3142_v54, %v3142_v54 }
 0x262   : > { %v4214_v28 = vcombine.low %v4206_v0, %v4213_v57  ;;  %v3704_v45 = vrot.slane %v3690_v61, %v6715_v33  ;;  %v3705_v21 = vcombine.high %v7091_v49, %v7091_v49  ;;  %v3663_v12 = vrot.slane %v3142_v54, %v6715_v33 }
 0x263   : > { %v4179_v62 = vrot.slane %v4165_v8, %v6715_v33  ;;  %v4181_v52 = vcombine.low %v3622_v14, %v7038_v27  ;;  %v3670_v63 = vrot.slane %v3656_v43, %v6715_v33  ;;  %v3707_v13 = vcombine.high %v3145_v30, %v3145_v30 }
 0x264   : > { %4391 = vst.msk [vmem:[%s6752_s22 + $0xc0] sm:$0xff] %vm4366_vm8, %v4214_v28  ;;  %v4249_v5 = vcombine.low %v3705_v21, %v3704_v45  ;;  %v3671_v47 = vcombine.high %v3663_v12, %v3663_v12  ;;  %v3706_v3 = vcombine.high %v3704_v45, %v3704_v45  ;;  %v3714_v4 = vrot.slane %v3145_v30, %v6715_v33 }
 0x265   : > { %v4196_v10 = vrot.slane %v7050_v16, %v6715_v33  ;;  %v4180_v37 = vcombine.low %v4172_v1, %v4179_v62  ;;  %v4189_v6 = vrot.slane %v4181_v52, %v6715_v33  ;;  %v3672_v9 = vcombine.high %v3670_v63, %v3670_v63 }
 0x266   : > { %v4215_v27 = vcombine.low %v3663_v12, %v3671_v47  ;;  %v4250_v58 = vcombine.low %v3706_v3, %v3714_v4  ;;  %v3107_v34 = vadd.f32 %v6710_v24, %v3064_v7  ;;  %v3721_v15 = vrot.slane %v3707_v13, %v6715_v33 }
 0x267   : > { %v4197_v11 = vcombine.low %v4189_v6, %v4196_v10  ;;  %4389 = vst.msk [vmem:[%s6752_s22 + $0xb0] sm:$0xff] %vm4366_vm8, %v4180_v37  ;;  %v4216_v29 = vcombine.low %v3670_v63, %v3672_v9  ;;  %v5260_v38 = vadd.f32 %v6963_v44, %v6912_v35  ;;  %v4257_v16 = vrot.slane %v4249_v5, %v6715_v33 }
 0x268   : > { %v4264_v42 = vrot.slane %v4250_v58, %v6715_v33  ;;  %v3143_v19 = vmax.f32 %v3107_v34, 0.0  ;;  %v5261_v46 = vadd.f32 %v6966_v60, %v6921_v20  ;;  %v4223_v36 = vrot.slane %v4215_v27, %v6715_v33 }
 0x269   : > { %4390 = vst.msk [vmem:[%s6752_s22 + $0xb8] sm:$0xff] %vm4366_vm8, %v4197_v11  ;;  %v4230_v22 = vrot.slane %v4216_v29, %v6715_v33  ;;  %v3069_v59 = vmul.f32 %v5260_v38, %v6705_v32  ;;  %v5262_v35 = vadd.f32 %v6975_v23, %v6928_v26  ;;  %v3722_v20 = vcombine.high %v3721_v15, %v3721_v15 }
 0x26a   : > { %v4265_v44 = vcombine.low %v4257_v16, %v4264_v42  ;;  %v3673_v55 = vcombine.high %v3143_v19, %v3143_v19  ;;  %v3680_v25 = vrot.slane %v3143_v19, %v6715_v33  ;;  %v3067_v7 = vmul.f32 %v5261_v46, %v6705_v32 }
 0x26b   : > { %v4231_v56 = vcombine.low %v4223_v36, %v4230_v22  ;;  %v3112_v60 = vadd.f32 %v6710_v24, %v3069_v59  ;;  %v3070_v2 = vmul.f32 %v5262_v35, %v6705_v32  ;;  %v5263_v26 = vadd.f32 %v6978_v41, %v6936_v39  ;;  %v5585_v32 = vld [vmem:[%s7231_s2] ss:$0 sm:$0xff] }
 0x26c   : > { %4394 = vst.msk [vmem:[%s6752_s22 + $0xd8] sm:$0xff] %vm4366_vm8, %v4265_v44  ;;  %v3687_v48 = vrot.slane %v3673_v55, %v6715_v33  ;;  %v3688_v50 = vcombine.high %v3680_v25, %v3680_v25  ;;  %v3110_v40 = vadd.f32 %v6710_v24, %v3067_v7  ;;  %v4266_v51 = vcombine.low %v3721_v15, %v3722_v20 }
 0x26d   : > { %4392 = vst.msk [vmem:[%s6752_s22 + $0xc8] sm:$0xff] %vm4366_vm8, %v4231_v56  ;;  %v3148_v23 = vmax.f32 %v3112_v60, 0.0  ;;  %v3113_v0 = vadd.f32 %v6710_v24, %v3070_v2  ;;  %v3068_v53 = vmul.f32 %v5585_v32, %v5263_v26 }
 0x26e   : > { %v3689_v18 = vcombine.high %v3687_v48, %v3687_v48  ;;  %v4232_v31 = vcombine.low %v3688_v50, %v3687_v48  ;;  %v3146_v17 = vmax.f32 %v3110_v40, 0.0  ;;  %v4274_v3 = vrot.slane %v4266_v51, %v6715_v33 }
 0x26f   : > { %v3757_v54 = vcombine.high %v3148_v23, %v3148_v23  ;;  %v3149_v57 = vmax.f32 %v3113_v0, 0.0  ;;  %v3764_v39 = vrot.slane %v3148_v23, %v6715_v33 }
 0x270   : > { %v4233_v61 = vcombine.low %v3689_v18, %v7091_v49  ;;  %v3723_v41 = vcombine.high %v3146_v17, %v3146_v17  ;;  %v3730_v30 = vrot.slane %v3146_v17, %v6715_v33  ;;  %v4240_v24 = vrot.slane %v4232_v31, %v6715_v33  ;;  %v5586_v49 = vld [vmem:[%s7232_s3] ss:$0 sm:$0xff] }
 0x271   : > { %v3771_v14 = vrot.slane %v3757_v54, %v6715_v33  ;;  %v3774_v8 = vcombine.high %v3149_v57, %v3149_v57  ;;  %v3781_v1 = vrot.slane %v3149_v57, %v6715_v33  ;;  %v3111_v21 = vadd.f32 %v5586_v49, %v3068_v53 }
 0x272   : > { %v4247_v43 = vrot.slane %v4233_v61, %v6715_v33  ;;  %v3737_v28 = vrot.slane %v3723_v41, %v6715_v33  ;;  %v3738_v45 = vcombine.high %v3730_v30, %v3730_v30  ;;  %v3772_v4 = vcombine.high %v3764_v39, %v3764_v39 }
 0x273   : > { %v3773_v12 = vcombine.high %v3771_v14, %v3771_v14  ;;  %v3788_v62 = vrot.slane %v3774_v8, %v6715_v33  ;;  %v3789_v52 = vcombine.high %v3781_v1, %v3781_v1  ;;  %v3147_v47 = vmax.f32 %v3111_v21, 0.0 }
 0x274   : > { %v4248_v63 = vcombine.low %v4240_v24, %v4247_v43  ;;  %v3739_v13 = vcombine.high %v3737_v28, %v3737_v28  ;;  %v4267_v5 = vcombine.low %v3730_v30, %v3738_v45  ;;  %v4301_v42 = vcombine.low %v3772_v4, %v3771_v14 }
 0x275   : > { %v4317_v10 = vcombine.low %v3773_v12, %v3781_v1  ;;  %v4318_v37 = vcombine.low %v3789_v52, %v3788_v62  ;;  %v3740_v27 = vcombine.high %v3147_v47, %v3147_v47  ;;  %v3747_v58 = vrot.slane %v3147_v47, %v6715_v33 }
 0x276   : > { %4393 = vst.msk [vmem:[%s6752_s22 + $0xd0] sm:$0xff] %vm4366_vm8, %v4248_v63  ;;  %v4281_v6 = vrot.slane %v4267_v5, %v6715_v33  ;;  %v4283_v9 = vcombine.low %v3737_v28, %v3739_v13  ;;  %v4315_v35 = vrot.slane %v4301_v42, %v6715_v33 }
 0x277   : > { %v4325_v34 = vrot.slane %v4317_v10, %v6715_v33  ;;  %v4332_v11 = vrot.slane %v4318_v37, %v6715_v33  ;;  %v3754_v15 = vrot.slane %v3740_v27, %v6715_v33  ;;  %v3755_v38 = vcombine.high %v3747_v58, %v3747_v58 }
 0x278   : > { %v4282_v29 = vcombine.low %v4274_v3, %v4281_v6  ;;  %v4291_v19 = vrot.slane %v4283_v9, %v6715_v33 }
 0x279   : > { %v4333_v16 = vcombine.low %v4325_v34, %v4332_v11  ;;  %v3756_v46 = vcombine.high %v3754_v15, %v3754_v15  ;;  %v4284_v36 = vcombine.low %v3747_v58, %v3755_v38 }
 0x27a   : > { %4395 = vst.msk [vmem:[%s6752_s22 + $0xe0] sm:$0xff] %vm4366_vm8, %v4282_v29 }
 0x27b   : > { %4398 = vst.msk [vmem:[%s6752_s22 + $0xf8] sm:$0xff] %vm4366_vm8, %v4333_v16  ;;  %v4298_v22 = vrot.slane %v4284_v36, %v6715_v33  ;;  %v4300_v59 = vcombine.low %v3756_v46, %v3764_v39 }
 0x27d   : > { %v4299_v44 = vcombine.low %v4291_v19, %v4298_v22  ;;  %v4308_v55 = vrot.slane %v4300_v59, %v6715_v33 }
 0x27f   : > { %v4316_v25 = vcombine.low %v4308_v55, %v4315_v35  ;;  %4396 = vst.msk [vmem:[%s6752_s22 + $0xe8] sm:$0xff] %vm4366_vm8, %v4299_v44 }
 0x281   : > { %4397 = vst.msk [vmem:[%s6752_s22 + $0xf0] sm:$0xff] %vm4366_vm8, %v4316_v25 }
 0x282   : > { %5600 = shalt.err (!%p5597_p5)
}
 0x283   : > { %s5601_s14 = scalar_lea.hbm %s7173_s9, 4096  ;;  %s5605_s24 = scalar_lea.hbm %s7233_s4, 8192 }
 0x284   : > { %p5602_p6 = scmp.ne.s32.totalorder %s7173_s9, %s5601_s14  ;;  %p5606_p10 = scmp.lt.u32.totalorder %s7173_s9, %s7233_s4 }
 0x285   : > { %p5607_p11 = scmp.lt.u32.totalorder %s5605_s24, %s5601_s14  ;;  %p5609_p13 = scmp.lt.u32.totalorder %s5601_s14, %s7173_s9 }
 0x286   : > { %p5603_p7 = pnand %p5602_p6, %p5736_p4 }
 0x287   : > { %p5608_p12 = por %p5607_p11, %p5606_p10 }
 0x288   : > { %p5604_p9 = pneg %p5603_p7 }
 0x289   : > { %p5610_p0 = por %p5609_p13, %p5608_p12 }
 0x28b   : > { %p5611_p1 = pnand %p5610_p0, %p5604_p9 }
 0x28d   : > { %5614 = shalt.err (!%p5611_p1)
}
 0x28e   : > { %s5669_s30 = smov 128   ;;  %s5670_s5 = smov 8  }
 0x28f   : > { %5527 = dma.vmem_to_hbm [thread:$0]  (%p5736_p4), %s7175_s6, 4096, %s7173_s9, %s7183_s18, %s5669_s30, %s5669_s30, %s5670_s5  }
 0x290 PF: > { %p5533_p2 = scmp.ge.s32.totalorder %s5665_s20, 2  ;;  %s4429_s7 = sand.u32 1, %s5645_s15  }
 0x291   : > { %s4430_s8 = scalar_lea.sflag [#allocation3], %s4429_s7 }
 0x292   : > { %p5530_p3 = pnand %p5533_p2, %p5743_p8 }
 0x294   : > { %5640 = dma.done.wait (!%p5530_p3), %s4430_s8, 4096  }
 0x295   : > { %5642 = vsyncadd (!%p5530_p3), %s4430_s8, 4294963200  ;;  %s17_s20 = sadd.s32 1, %s5665_s20   ;;  %s7301_s15 = smov %s5649_s16 }
 0x296   : > { %p14_p5 = scmp.ge.s32.totalorder %s17_s20, 4   ;;  %s7302_s16 = smov %s5653_s17 }
 0x297   : > { %s7303_s17 = smov %s5749_s28  ;;  %s7304_s18 = smov %s5661_s19 }
 0x298   : > { %s7305_s19 = smov %s7307_s23  ;;  %16 = sbr.rel (!%p14_p5) target bundleno = 4 (0x4), region = 88 }
 0x29f   :  { %4435 = vsyncpa [#allocation3], 1 }
 0x2a0   :  { %4437 = vsyncpa [#allocation3 + $0x1], 1 }

</bundles_post_ra>
